<compile_context>
chip_gen: v7x
topology: tpu7x:2x2x1
jax: 0.10.0
libtpu: 0.0.40
codegen_flags: <defaults>
</compile_context>

<pallas_src>
import math
import functools

import jax
import jax.numpy as jnp
from jax import lax
from jax.experimental import pallas as pl
from jax.experimental.pallas import tpu as pltpu


MATMUL_DTYPE = jnp.bfloat16   # MXU input dtype (f32 accumulation everywhere)


# ----------------------------- fused kernel -----------------------------

def _transformer_block_kernel(
    x_ref,                                   # (block_b*S, D)  f32
    wqkv_ref, bqkv_ref,                      # (D, 3D) bf16 (Q cols pre-scaled), (1, 3D) f32
    wo_ref, bo_ref,                          # (D, D)  bf16, (1, D)  f32
    w1_ref, b1_ref,                          # (D, F)  bf16, (1, F)  f32
    w2_ref, b2_ref,                          # (F, D)  bf16, (1, D)  f32
    g1_ref, beta1_ref, g2_ref, beta2_ref,    # (1, D) f32 each
    o_ref,                                   # (block_b*S, D) f32
    ctx_ref,                                 # VMEM scratch (block_b*S, D) f32
    *, batch_block, seq_len, num_heads, eps):
    D = x_ref.shape[-1]
    S = seq_len
    dk = D // num_heads

    x = x_ref[...]                                     # (R, D) f32, VMEM-resident
    x_mm = x.astype(MATMUL_DTYPE)

    # ---- fused QKV projection (one matmul); single bf16 cast of qkv ----
    qkv = jnp.dot(x_mm, wqkv_ref[...],
                  preferred_element_type=jnp.float32) + bqkv_ref[...]   # (R, 3D) f32
    qkv_bf = qkv.astype(MATMUL_DTYPE)       # Q part already scaled by 1/sqrt(dk)

    # ---- multi-head attention; per-head PV written into VMEM scratch slab ----
    # (no .T transposes, no lane-axis concatenate)
    for b in range(batch_block):            # static unroll (small block_b)
        rows = slice(b * S, (b + 1) * S)
        qkv_b = qkv_bf[rows, :]
        for h in range(num_heads):           # static unroll (small H)
            cols = slice(h * dk, (h + 1) * dk)
            qh = qkv_b[:, cols]                                   # (S, dk) bf16, pre-scaled
            kh = qkv_b[:, D + h * dk: D + (h + 1) * dk]           # (S, dk) bf16
            vh = qkv_b[:, 2 * D + h * dk: 2 * D + (h + 1) * dk]   # (S, dk) bf16
            # contract last dims of q and k directly (no kh.T / vxpose)
            scores = lax.dot_general(
                qh, kh, dimension_numbers=(((1,), (1,)), ((), ())),
                preferred_element_type=jnp.float32)               # (S, S) f32
            m = jnp.max(scores, axis=-1, keepdims=True)
            e = jnp.exp(scores - m)                               # f32 (v5e-safe)
            p = e * pl.reciprocal(jnp.sum(e, axis=-1, keepdims=True), approx=True)
            ctx_ref[rows, cols] = jnp.dot(p.astype(MATMUL_DTYPE), vh,
                                          preferred_element_type=jnp.float32)

    attn_out = jnp.dot(ctx_ref[...].astype(MATMUL_DTYPE), wo_ref[...],
                       preferred_element_type=jnp.float32) + bo_ref[...]

    # ---- residual + LayerNorm 1 (biased variance, PyTorch semantics) ----
    z1 = x + attn_out
    mu1 = jnp.mean(z1, axis=-1, keepdims=True)
    var1 = jnp.mean((z1 - mu1) ** 2, axis=-1, keepdims=True)
    y1 = (z1 - mu1) * lax.rsqrt(var1 + eps) * g1_ref[...] + beta1_ref[...]

    # ---- feed-forward (intermediate (R, F) never leaves VMEM) ----
    hdn = jnp.dot(y1.astype(MATMUL_DTYPE), w1_ref[...],
                  preferred_element_type=jnp.float32) + b1_ref[...]
    hdn = jnp.maximum(hdn, 0.0)
    ffn = jnp.dot(hdn.astype(MATMUL_DTYPE), w2_ref[...],
                  preferred_element_type=jnp.float32) + b2_ref[...]

    # ---- residual + LayerNorm 2 ----
    z2 = y1 + ffn
    mu2 = jnp.mean(z2, axis=-1, keepdims=True)
    var2 = jnp.mean((z2 - mu2) ** 2, axis=-1, keepdims=True)
    o_ref[...] = ((z2 - mu2) * lax.rsqrt(var2 + eps)
                  * g2_ref[...] + beta2_ref[...]).astype(o_ref.dtype)


# ------------------------------- wrapper -------------------------------

def _vmem_limit_bytes(block_b, S, D, F):
    """Explicit scoped-VMEM request, sized from the tiles with headroom."""
    bf, f32 = 2, 4
    weights = (D * 3 * D + D * D + D * F + F * D) * bf
    small = (3 * D + D + F + D + 4 * D) * f32
    io_block = block_b * S * D * f32                  # one x / out tile
    inter = block_b * S * (3 * D + F + D) * f32       # qkv + hdn + ctx slab
    est = 2 * weights + small + 4 * io_block + 4 * inter + (4 << 20)
    # at least the v6e default, never more than leaves HW headroom on v5e/v6e
    return int(min(max(est, 32 << 20), 96 << 20))


def transformer_block(x, p, *, num_heads, eps=1e-5, block_b=None):
    """Fused TransformerBlock forward on x of shape (B, S, D) (eval mode)."""
    B, S, D = x.shape
    d_ff = p["w1"].shape[1]
    if block_b is None:
        block_b = B                       # toy sizes: whole problem = 1 grid step
    assert B % block_b == 0
    rows_blk = block_b * S
    grid = (B // block_b,)
    # (8,128) tiling constraint when the block is not the full array
    assert block_b == B or (rows_blk % 8 == 0 and D % 128 == 0)

    # Present activations as a lane-dense (B*S, D) slab (free XLA reshape).
    x2 = x.reshape(B * S, D)

    def resident(shape):
        # Constant index map -> DMA'd once; single-buffered (no pointless 2x VMEM).
        return pl.BlockSpec(shape, lambda i: (0,) * len(shape),
                            pipeline_mode=pl.Buffered(1))

    kernel = functools.partial(_transformer_block_kernel,
                               batch_block=block_b, seq_len=S,
                               num_heads=num_heads, eps=eps)
    out = pl.pallas_call(
        kernel,
        out_shape=jax.ShapeDtypeStruct((B * S, D), jnp.float32),
        grid_spec=pltpu.PrefetchScalarGridSpec(
            num_scalar_prefetch=0,
            grid=grid,
            in_specs=[
                pl.BlockSpec((rows_blk, D), lambda i: (i, 0)),      # x slab
                resident((D, 3 * D)), resident((1, 3 * D)),         # wqkv, bqkv
                resident((D, D)),     resident((1, D)),             # wo, bo
                resident((D, d_ff)),  resident((1, d_ff)),          # w1, b1
                resident((d_ff, D)),  resident((1, D)),             # w2, b2
                resident((1, D)), resident((1, D)),                 # g1, beta1
                resident((1, D)), resident((1, D)),                 # g2, beta2
            ],
            out_specs=pl.BlockSpec((rows_blk, D), lambda i: (i, 0)),
            scratch_shapes=[pltpu.VMEM((rows_blk, D), jnp.float32)],  # ctx slab
        ),
        compiler_params=pltpu.CompilerParams(
            dimension_semantics=("parallel",),          # shard grid steps across TCs
            vmem_limit_bytes=_vmem_limit_bytes(block_b, S, D, d_ff),
        ),
    )(x2, p["wqkv"], p["bqkv"], p["wo"], p["bo"],
      p["w1"], p["b1"], p["w2"], p["b2"],
      p["g1"], p["beta1"], p["g2"], p["beta2"])
    return out.reshape(B, S, D)


# ------------------------------ parameters ------------------------------

def init_torch_style_params(key, d_model, num_heads, d_ff, scale=0.02):
    """Plain f32 parameters mirroring the PyTorch module ((in, out) weights)."""
    ks = jax.random.split(key, 12)

    def w(k, i, o): return scale * jax.random.normal(k, (i, o), jnp.float32)
    def b(k, o):    return scale * jax.random.normal(k, (o,), jnp.float32)

    return dict(
        wq=w(ks[0], d_model, d_model), bq=b(ks[1], d_model),
        wk=w(ks[2], d_model, d_model), bk=b(ks[3], d_model),
        wv=w(ks[4], d_model, d_model), bv=b(ks[5], d_model),
        wo=w(ks[6], d_model, d_model), bo=b(ks[7], d_model),
        w1=w(ks[8], d_model, d_ff),    b1=b(ks[9], d_ff),
        w2=w(ks[10], d_ff, d_model),   b2=b(ks[11], d_model),
        g1=jnp.ones((d_model,), jnp.float32), beta1=jnp.zeros((d_model,), jnp.float32),
        g2=jnp.ones((d_model,), jnp.float32), beta2=jnp.zeros((d_model,), jnp.float32),
    )


def pack_params(tp, num_heads):
    """Kernel layout: fused QKV weight with 1/sqrt(dk) baked into Q, bf16 matmul weights."""
    D = tp["wq"].shape[0]
    d_ff = tp["w1"].shape[1]
    s = 1.0 / math.sqrt(D // num_heads)
    return dict(
        wqkv=jnp.concatenate([tp["wq"] * s, tp["wk"], tp["wv"]], axis=1).astype(MATMUL_DTYPE),
        bqkv=jnp.concatenate([tp["bq"] * s, tp["bk"], tp["bv"]]).reshape(1, 3 * D).astype(jnp.float32),
        wo=tp["wo"].astype(MATMUL_DTYPE), bo=tp["bo"].reshape(1, D),
        w1=tp["w1"].astype(MATMUL_DTYPE), b1=tp["b1"].reshape(1, d_ff),
        w2=tp["w2"].astype(MATMUL_DTYPE), b2=tp["b2"].reshape(1, D),
        g1=tp["g1"].reshape(1, D), beta1=tp["beta1"].reshape(1, D),
        g2=tp["g2"].reshape(1, D), beta2=tp["beta2"].reshape(1, D),
    )


# --------------------------- pure-JAX reference ---------------------------

def transformer_block_reference(x, tp, *, num_heads, eps=1e-5):
    """f32 reference matching the PyTorch TransformerBlock (eval mode)."""
    B, S, D = x.shape
    dk = D // num_heads

    def lin(t, w, b): return t @ w + b

    def split(t):  # (B, S, D) -> (B, H, S, dk)
        return t.reshape(B, S, num_heads, dk).transpose(0, 2, 1, 3)

    q = split(lin(x, tp["wq"], tp["bq"]))
    k = split(lin(x, tp["wk"], tp["bk"]))
    v = split(lin(x, tp["wv"], tp["bv"]))
    scores = jnp.einsum("bhqd,bhkd->bhqk", q, k) / math.sqrt(dk)
    p = jax.nn.softmax(scores, axis=-1)
    ctx = jnp.einsum("bhqk,bhkd->bhqd", p, v).transpose(0, 2, 1, 3).reshape(B, S, D)
    attn = lin(ctx, tp["wo"], tp["bo"])

    def ln(z, g, b):
        mu = z.mean(-1, keepdims=True)
        var = ((z - mu) ** 2).mean(-1, keepdims=True)
        return (z - mu) * lax.rsqrt(var + eps) * g + b

    y1 = ln(x + attn, tp["g1"], tp["beta1"])
    ffn = lin(jnp.maximum(lin(y1, tp["w1"], tp["b1"]), 0.0), tp["w2"], tp["b2"])
    return ln(y1 + ffn, tp["g2"], tp["beta2"])


# --------------------------------- main ---------------------------------

if __name__ == "__main__":
    # Small demo shapes; d_model=128 keeps the output store lane-dense (per review).
    B, S = 2, 8
    d_model, num_heads, d_ff = 128, 4, 256

    key = jax.random.PRNGKey(0)
    kx, kp = jax.random.split(key)
    x = jax.random.normal(kx, (B, S, d_model), jnp.float32)

    torch_params = init_torch_style_params(kp, d_model, num_heads, d_ff)
    params = pack_params(torch_params, num_heads)

    y = transformer_block(x, params, num_heads=num_heads)
    y = jax.block_until_ready(y)

    assert y.shape == (B, S, d_model)
    assert bool(jnp.all(jnp.isfinite(y)))

    # Tolerance-asserted f32 reference (bf16 weights/activations + approx
    # reciprocal in the kernel => loose-but-tight-enough tolerance).
    y_ref = transformer_block_reference(x, torch_params, num_heads=num_heads)
    max_err = float(jnp.max(jnp.abs(y - y_ref)))
    assert bool(jnp.allclose(y, y_ref, atol=5e-2, rtol=5e-2)), f"max abs err {max_err}"

    print("KERNEL_OK")
</pallas_src>

<mosaic_0001>
module attributes {stable_mosaic.version = 11 : i64} {
  func.func @_transformer_block_kernel(%arg0: i32, %arg1: memref<16x128xf32, #tpu.memory_space<vmem>>, %arg2: memref<128x384xbf16, #tpu.memory_space<vmem>>, %arg3: memref<1x384xf32, #tpu.memory_space<vmem>>, %arg4: memref<128x128xbf16, #tpu.memory_space<vmem>>, %arg5: memref<1x128xf32, #tpu.memory_space<vmem>>, %arg6: memref<128x256xbf16, #tpu.memory_space<vmem>>, %arg7: memref<1x256xf32, #tpu.memory_space<vmem>>, %arg8: memref<256x128xbf16, #tpu.memory_space<vmem>>, %arg9: memref<1x128xf32, #tpu.memory_space<vmem>>, %arg10: memref<1x128xf32, #tpu.memory_space<vmem>>, %arg11: memref<1x128xf32, #tpu.memory_space<vmem>>, %arg12: memref<1x128xf32, #tpu.memory_space<vmem>>, %arg13: memref<1x128xf32, #tpu.memory_space<vmem>>, %arg14: memref<16x128xf32, #tpu.memory_space<vmem>>, %arg15: memref<16x128xf32, #tpu.memory_space<vmem>>) attributes {dimension_semantics = [#tpu.dimension_semantics<parallel>], iteration_bounds = array<i64: 1>, scalar_prefetch = 0 : i64, scratch_operands = 1 : i64, tpu.core_type = #tpu.core_type<tc>, window_params = [{transform_indices = @transform_0, window_bounds = array<i64: 16, 128>}, {pipeline_mode = #tpu.pipeline_mode<synchronous>, transform_indices = @transform_1, window_bounds = array<i64: 128, 384>}, {pipeline_mode = #tpu.pipeline_mode<synchronous>, transform_indices = @transform_2, window_bounds = array<i64: 1, 384>}, {pipeline_mode = #tpu.pipeline_mode<synchronous>, transform_indices = @transform_3, window_bounds = array<i64: 128, 128>}, {pipeline_mode = #tpu.pipeline_mode<synchronous>, transform_indices = @transform_4, window_bounds = array<i64: 1, 128>}, {pipeline_mode = #tpu.pipeline_mode<synchronous>, transform_indices = @transform_5, window_bounds = array<i64: 128, 256>}, {pipeline_mode = #tpu.pipeline_mode<synchronous>, transform_indices = @transform_6, window_bounds = array<i64: 1, 256>}, {pipeline_mode = #tpu.pipeline_mode<synchronous>, transform_indices = @transform_7, window_bounds = array<i64: 256, 128>}, {pipeline_mode = #tpu.pipeline_mode<synchronous>, transform_indices = @transform_8, window_bounds = array<i64: 1, 128>}, {pipeline_mode = #tpu.pipeline_mode<synchronous>, transform_indices = @transform_9, window_bounds = array<i64: 1, 128>}, {pipeline_mode = #tpu.pipeline_mode<synchronous>, transform_indices = @transform_10, window_bounds = array<i64: 1, 128>}, {pipeline_mode = #tpu.pipeline_mode<synchronous>, transform_indices = @transform_11, window_bounds = array<i64: 1, 128>}, {pipeline_mode = #tpu.pipeline_mode<synchronous>, transform_indices = @transform_12, window_bounds = array<i64: 1, 128>}, {transform_indices = @transform_13, window_bounds = array<i64: 16, 128>}]} {
    %c0 = arith.constant 0 : index
    %c0_0 = arith.constant 0 : index
    %0 = vector.load %arg1[%c0, %c0_0] : memref<16x128xf32, #tpu.memory_space<vmem>>, vector<16x128xf32>
    %1 = arith.truncf %0 : vector<16x128xf32> to vector<16x128xbf16>
    %c0_1 = arith.constant 0 : index
    %c0_2 = arith.constant 0 : index
    %2 = vector.load %arg2[%c0_1, %c0_2] : memref<128x384xbf16, #tpu.memory_space<vmem>>, vector<128x384xbf16>
    %cst = arith.constant dense<0.000000e+00> : vector<16x384xf32>
    %3 = tpu.matmul %1, %2, %cst {dimension_numbers = #tpu.dot_dimension_numbers<[1], [0], [0], [1], [0, 0, 1, 1], [], []>} : vector<16x128xbf16>, vector<128x384xbf16>, vector<16x384xf32> -> vector<16x384xf32>
    %c0_3 = arith.constant 0 : index
    %c0_4 = arith.constant 0 : index
    %4 = vector.load %arg3[%c0_3, %c0_4] : memref<1x384xf32, #tpu.memory_space<vmem>>, vector<1x384xf32>
    %5 = vector.broadcast %4 : vector<1x384xf32> to vector<16x384xf32>
    %6 = arith.addf %3, %5 : vector<16x384xf32>
    %7 = arith.truncf %6 : vector<16x384xf32> to vector<16x384xbf16>
    %8 = vector.extract_strided_slice %7 {offsets = [0, 0], sizes = [8, 384], strides = [1, 1]} : vector<16x384xbf16> to vector<8x384xbf16>
    %9 = vector.extract_strided_slice %8 {offsets = [0, 0], sizes = [8, 32], strides = [1, 1]} : vector<8x384xbf16> to vector<8x32xbf16>
    %10 = vector.extract_strided_slice %8 {offsets = [0, 128], sizes = [8, 32], strides = [1, 1]} : vector<8x384xbf16> to vector<8x32xbf16>
    %11 = vector.extract_strided_slice %8 {offsets = [0, 256], sizes = [8, 32], strides = [1, 1]} : vector<8x384xbf16> to vector<8x32xbf16>
    %cst_5 = arith.constant dense<0.000000e+00> : vector<8x8xf32>
    %12 = tpu.matmul %9, %10, %cst_5 {dimension_numbers = #tpu.dot_dimension_numbers<[1], [1], [0], [0], [0, 0, 1, 0], [], []>} : vector<8x32xbf16>, vector<8x32xbf16>, vector<8x8xf32> -> vector<8x8xf32>
    %cst_6 = arith.constant dense<0xFF800000> : vector<8xf32>
    %13 = vector.multi_reduction <maximumf>, %12, %cst_6 [1] : vector<8x8xf32> to vector<8xf32>
    %14 = vector.shape_cast %13 : vector<8xf32> to vector<8x1xf32>
    %15 = vector.broadcast %14 : vector<8x1xf32> to vector<8x8xf32>
    %16 = arith.subf %12, %15 : vector<8x8xf32>
    %17 = math.exp %16 : vector<8x8xf32>
    %cst_7 = arith.constant dense<0.000000e+00> : vector<8xf32>
    %18 = vector.multi_reduction <add>, %17, %cst_7 [1] : vector<8x8xf32> to vector<8xf32>
    %19 = vector.shape_cast %18 : vector<8xf32> to vector<8x1xf32>
    %20 = tpu.reciprocal %19 {approx = true} : vector<8x1xf32> -> vector<8x1xf32>
    %21 = vector.broadcast %20 : vector<8x1xf32> to vector<8x8xf32>
    %22 = arith.mulf %17, %21 : vector<8x8xf32>
    %23 = arith.truncf %22 : vector<8x8xf32> to vector<8x8xbf16>
    %cst_8 = arith.constant dense<0.000000e+00> : vector<8x32xf32>
    %24 = tpu.matmul %23, %11, %cst_8 {dimension_numbers = #tpu.dot_dimension_numbers<[1], [0], [0], [1], [0, 0, 1, 1], [], []>} : vector<8x8xbf16>, vector<8x32xbf16>, vector<8x32xf32> -> vector<8x32xf32>
    %c0_9 = arith.constant 0 : index
    %c0_10 = arith.constant 0 : index
    %25 = vector.load %arg15[%c0_9, %c0_10] : memref<16x128xf32, #tpu.memory_space<vmem>>, vector<8x32xf32>
    tpu.vector_store %arg15[%c0_9, %c0_10], %24 {strides = array<i32>} : memref<16x128xf32, #tpu.memory_space<vmem>>, vector<8x32xf32>,
    %26 = vector.extract_strided_slice %8 {offsets = [0, 32], sizes = [8, 32], strides = [1, 1]} : vector<8x384xbf16> to vector<8x32xbf16>
    %27 = vector.extract_strided_slice %8 {offsets = [0, 160], sizes = [8, 32], strides = [1, 1]} : vector<8x384xbf16> to vector<8x32xbf16>
    %28 = vector.extract_strided_slice %8 {offsets = [0, 288], sizes = [8, 32], strides = [1, 1]} : vector<8x384xbf16> to vector<8x32xbf16>
    %cst_11 = arith.constant dense<0.000000e+00> : vector<8x8xf32>
    %29 = tpu.matmul %26, %27, %cst_11 {dimension_numbers = #tpu.dot_dimension_numbers<[1], [1], [0], [0], [0, 0, 1, 0], [], []>} : vector<8x32xbf16>, vector<8x32xbf16>, vector<8x8xf32> -> vector<8x8xf32>
    %cst_12 = arith.constant dense<0xFF800000> : vector<8xf32>
    %30 = vector.multi_reduction <maximumf>, %29, %cst_12 [1] : vector<8x8xf32> to vector<8xf32>
    %31 = vector.shape_cast %30 : vector<8xf32> to vector<8x1xf32>
    %32 = vector.broadcast %31 : vector<8x1xf32> to vector<8x8xf32>
    %33 = arith.subf %29, %32 : vector<8x8xf32>
    %34 = math.exp %33 : vector<8x8xf32>
    %cst_13 = arith.constant dense<0.000000e+00> : vector<8xf32>
    %35 = vector.multi_reduction <add>, %34, %cst_13 [1] : vector<8x8xf32> to vector<8xf32>
    %36 = vector.shape_cast %35 : vector<8xf32> to vector<8x1xf32>
    %37 = tpu.reciprocal %36 {approx = true} : vector<8x1xf32> -> vector<8x1xf32>
    %38 = vector.broadcast %37 : vector<8x1xf32> to vector<8x8xf32>
    %39 = arith.mulf %34, %38 : vector<8x8xf32>
    %40 = arith.truncf %39 : vector<8x8xf32> to vector<8x8xbf16>
    %cst_14 = arith.constant dense<0.000000e+00> : vector<8x32xf32>
    %41 = tpu.matmul %40, %28, %cst_14 {dimension_numbers = #tpu.dot_dimension_numbers<[1], [0], [0], [1], [0, 0, 1, 1], [], []>} : vector<8x8xbf16>, vector<8x32xbf16>, vector<8x32xf32> -> vector<8x32xf32>
    %c0_15 = arith.constant 0 : index
    %c32 = arith.constant 32 : index
    %42 = vector.load %arg15[%c0_15, %c32] : memref<16x128xf32, #tpu.memory_space<vmem>>, vector<8x32xf32>
    tpu.vector_store %arg15[%c0_15, %c32], %41 {strides = array<i32>} : memref<16x128xf32, #tpu.memory_space<vmem>>, vector<8x32xf32>,
    %43 = vector.extract_strided_slice %8 {offsets = [0, 64], sizes = [8, 32], strides = [1, 1]} : vector<8x384xbf16> to vector<8x32xbf16>
    %44 = vector.extract_strided_slice %8 {offsets = [0, 192], sizes = [8, 32], strides = [1, 1]} : vector<8x384xbf16> to vector<8x32xbf16>
    %45 = vector.extract_strided_slice %8 {offsets = [0, 320], sizes = [8, 32], strides = [1, 1]} : vector<8x384xbf16> to vector<8x32xbf16>
    %cst_16 = arith.constant dense<0.000000e+00> : vector<8x8xf32>
    %46 = tpu.matmul %43, %44, %cst_16 {dimension_numbers = #tpu.dot_dimension_numbers<[1], [1], [0], [0], [0, 0, 1, 0], [], []>} : vector<8x32xbf16>, vector<8x32xbf16>, vector<8x8xf32> -> vector<8x8xf32>
    %cst_17 = arith.constant dense<0xFF800000> : vector<8xf32>
    %47 = vector.multi_reduction <maximumf>, %46, %cst_17 [1] : vector<8x8xf32> to vector<8xf32>
    %48 = vector.shape_cast %47 : vector<8xf32> to vector<8x1xf32>
    %49 = vector.broadcast %48 : vector<8x1xf32> to vector<8x8xf32>
    %50 = arith.subf %46, %49 : vector<8x8xf32>
    %51 = math.exp %50 : vector<8x8xf32>
    %cst_18 = arith.constant dense<0.000000e+00> : vector<8xf32>
    %52 = vector.multi_reduction <add>, %51, %cst_18 [1] : vector<8x8xf32> to vector<8xf32>
    %53 = vector.shape_cast %52 : vector<8xf32> to vector<8x1xf32>
    %54 = tpu.reciprocal %53 {approx = true} : vector<8x1xf32> -> vector<8x1xf32>
    %55 = vector.broadcast %54 : vector<8x1xf32> to vector<8x8xf32>
    %56 = arith.mulf %51, %55 : vector<8x8xf32>
    %57 = arith.truncf %56 : vector<8x8xf32> to vector<8x8xbf16>
    %cst_19 = arith.constant dense<0.000000e+00> : vector<8x32xf32>
    %58 = tpu.matmul %57, %45, %cst_19 {dimension_numbers = #tpu.dot_dimension_numbers<[1], [0], [0], [1], [0, 0, 1, 1], [], []>} : vector<8x8xbf16>, vector<8x32xbf16>, vector<8x32xf32> -> vector<8x32xf32>
    %c0_20 = arith.constant 0 : index
    %c64 = arith.constant 64 : index
    %59 = vector.load %arg15[%c0_20, %c64] : memref<16x128xf32, #tpu.memory_space<vmem>>, vector<8x32xf32>
    tpu.vector_store %arg15[%c0_20, %c64], %58 {strides = array<i32>} : memref<16x128xf32, #tpu.memory_space<vmem>>, vector<8x32xf32>,
    %60 = vector.extract_strided_slice %8 {offsets = [0, 96], sizes = [8, 32], strides = [1, 1]} : vector<8x384xbf16> to vector<8x32xbf16>
    %61 = vector.extract_strided_slice %8 {offsets = [0, 224], sizes = [8, 32], strides = [1, 1]} : vector<8x384xbf16> to vector<8x32xbf16>
    %62 = vector.extract_strided_slice %8 {offsets = [0, 352], sizes = [8, 32], strides = [1, 1]} : vector<8x384xbf16> to vector<8x32xbf16>
    %cst_21 = arith.constant dense<0.000000e+00> : vector<8x8xf32>
    %63 = tpu.matmul %60, %61, %cst_21 {dimension_numbers = #tpu.dot_dimension_numbers<[1], [1], [0], [0], [0, 0, 1, 0], [], []>} : vector<8x32xbf16>, vector<8x32xbf16>, vector<8x8xf32> -> vector<8x8xf32>
    %cst_22 = arith.constant dense<0xFF800000> : vector<8xf32>
    %64 = vector.multi_reduction <maximumf>, %63, %cst_22 [1] : vector<8x8xf32> to vector<8xf32>
    %65 = vector.shape_cast %64 : vector<8xf32> to vector<8x1xf32>
    %66 = vector.broadcast %65 : vector<8x1xf32> to vector<8x8xf32>
    %67 = arith.subf %63, %66 : vector<8x8xf32>
    %68 = math.exp %67 : vector<8x8xf32>
    %cst_23 = arith.constant dense<0.000000e+00> : vector<8xf32>
    %69 = vector.multi_reduction <add>, %68, %cst_23 [1] : vector<8x8xf32> to vector<8xf32>
    %70 = vector.shape_cast %69 : vector<8xf32> to vector<8x1xf32>
    %71 = tpu.reciprocal %70 {approx = true} : vector<8x1xf32> -> vector<8x1xf32>
    %72 = vector.broadcast %71 : vector<8x1xf32> to vector<8x8xf32>
    %73 = arith.mulf %68, %72 : vector<8x8xf32>
    %74 = arith.truncf %73 : vector<8x8xf32> to vector<8x8xbf16>
    %cst_24 = arith.constant dense<0.000000e+00> : vector<8x32xf32>
    %75 = tpu.matmul %74, %62, %cst_24 {dimension_numbers = #tpu.dot_dimension_numbers<[1], [0], [0], [1], [0, 0, 1, 1], [], []>} : vector<8x8xbf16>, vector<8x32xbf16>, vector<8x32xf32> -> vector<8x32xf32>
    %c0_25 = arith.constant 0 : index
    %c96 = arith.constant 96 : index
    %76 = vector.load %arg15[%c0_25, %c96] : memref<16x128xf32, #tpu.memory_space<vmem>>, vector<8x32xf32>
    tpu.vector_store %arg15[%c0_25, %c96], %75 {strides = array<i32>} : memref<16x128xf32, #tpu.memory_space<vmem>>, vector<8x32xf32>,
    %77 = vector.extract_strided_slice %7 {offsets = [8, 0], sizes = [8, 384], strides = [1, 1]} : vector<16x384xbf16> to vector<8x384xbf16>
    %78 = vector.extract_strided_slice %77 {offsets = [0, 0], sizes = [8, 32], strides = [1, 1]} : vector<8x384xbf16> to vector<8x32xbf16>
    %79 = vector.extract_strided_slice %77 {offsets = [0, 128], sizes = [8, 32], strides = [1, 1]} : vector<8x384xbf16> to vector<8x32xbf16>
    %80 = vector.extract_strided_slice %77 {offsets = [0, 256], sizes = [8, 32], strides = [1, 1]} : vector<8x384xbf16> to vector<8x32xbf16>
    %cst_26 = arith.constant dense<0.000000e+00> : vector<8x8xf32>
    %81 = tpu.matmul %78, %79, %cst_26 {dimension_numbers = #tpu.dot_dimension_numbers<[1], [1], [0], [0], [0, 0, 1, 0], [], []>} : vector<8x32xbf16>, vector<8x32xbf16>, vector<8x8xf32> -> vector<8x8xf32>
    %cst_27 = arith.constant dense<0xFF800000> : vector<8xf32>
    %82 = vector.multi_reduction <maximumf>, %81, %cst_27 [1] : vector<8x8xf32> to vector<8xf32>
    %83 = vector.shape_cast %82 : vector<8xf32> to vector<8x1xf32>
    %84 = vector.broadcast %83 : vector<8x1xf32> to vector<8x8xf32>
    %85 = arith.subf %81, %84 : vector<8x8xf32>
    %86 = math.exp %85 : vector<8x8xf32>
    %cst_28 = arith.constant dense<0.000000e+00> : vector<8xf32>
    %87 = vector.multi_reduction <add>, %86, %cst_28 [1] : vector<8x8xf32> to vector<8xf32>
    %88 = vector.shape_cast %87 : vector<8xf32> to vector<8x1xf32>
    %89 = tpu.reciprocal %88 {approx = true} : vector<8x1xf32> -> vector<8x1xf32>
    %90 = vector.broadcast %89 : vector<8x1xf32> to vector<8x8xf32>
    %91 = arith.mulf %86, %90 : vector<8x8xf32>
    %92 = arith.truncf %91 : vector<8x8xf32> to vector<8x8xbf16>
    %cst_29 = arith.constant dense<0.000000e+00> : vector<8x32xf32>
    %93 = tpu.matmul %92, %80, %cst_29 {dimension_numbers = #tpu.dot_dimension_numbers<[1], [0], [0], [1], [0, 0, 1, 1], [], []>} : vector<8x8xbf16>, vector<8x32xbf16>, vector<8x32xf32> -> vector<8x32xf32>
    %c8 = arith.constant 8 : index
    %c0_30 = arith.constant 0 : index
    %94 = vector.load %arg15[%c8, %c0_30] : memref<16x128xf32, #tpu.memory_space<vmem>>, vector<8x32xf32>
    tpu.vector_store %arg15[%c8, %c0_30], %93 {strides = array<i32>} : memref<16x128xf32, #tpu.memory_space<vmem>>, vector<8x32xf32>,
    %95 = vector.extract_strided_slice %77 {offsets = [0, 32], sizes = [8, 32], strides = [1, 1]} : vector<8x384xbf16> to vector<8x32xbf16>
    %96 = vector.extract_strided_slice %77 {offsets = [0, 160], sizes = [8, 32], strides = [1, 1]} : vector<8x384xbf16> to vector<8x32xbf16>
    %97 = vector.extract_strided_slice %77 {offsets = [0, 288], sizes = [8, 32], strides = [1, 1]} : vector<8x384xbf16> to vector<8x32xbf16>
    %cst_31 = arith.constant dense<0.000000e+00> : vector<8x8xf32>
    %98 = tpu.matmul %95, %96, %cst_31 {dimension_numbers = #tpu.dot_dimension_numbers<[1], [1], [0], [0], [0, 0, 1, 0], [], []>} : vector<8x32xbf16>, vector<8x32xbf16>, vector<8x8xf32> -> vector<8x8xf32>
    %cst_32 = arith.constant dense<0xFF800000> : vector<8xf32>
    %99 = vector.multi_reduction <maximumf>, %98, %cst_32 [1] : vector<8x8xf32> to vector<8xf32>
    %100 = vector.shape_cast %99 : vector<8xf32> to vector<8x1xf32>
    %101 = vector.broadcast %100 : vector<8x1xf32> to vector<8x8xf32>
    %102 = arith.subf %98, %101 : vector<8x8xf32>
    %103 = math.exp %102 : vector<8x8xf32>
    %cst_33 = arith.constant dense<0.000000e+00> : vector<8xf32>
    %104 = vector.multi_reduction <add>, %103, %cst_33 [1] : vector<8x8xf32> to vector<8xf32>
    %105 = vector.shape_cast %104 : vector<8xf32> to vector<8x1xf32>
    %106 = tpu.reciprocal %105 {approx = true} : vector<8x1xf32> -> vector<8x1xf32>
    %107 = vector.broadcast %106 : vector<8x1xf32> to vector<8x8xf32>
    %108 = arith.mulf %103, %107 : vector<8x8xf32>
    %109 = arith.truncf %108 : vector<8x8xf32> to vector<8x8xbf16>
    %cst_34 = arith.constant dense<0.000000e+00> : vector<8x32xf32>
    %110 = tpu.matmul %109, %97, %cst_34 {dimension_numbers = #tpu.dot_dimension_numbers<[1], [0], [0], [1], [0, 0, 1, 1], [], []>} : vector<8x8xbf16>, vector<8x32xbf16>, vector<8x32xf32> -> vector<8x32xf32>
    %c8_35 = arith.constant 8 : index
    %c32_36 = arith.constant 32 : index
    %111 = vector.load %arg15[%c8_35, %c32_36] : memref<16x128xf32, #tpu.memory_space<vmem>>, vector<8x32xf32>
    tpu.vector_store %arg15[%c8_35, %c32_36], %110 {strides = array<i32>} : memref<16x128xf32, #tpu.memory_space<vmem>>, vector<8x32xf32>,
    %112 = vector.extract_strided_slice %77 {offsets = [0, 64], sizes = [8, 32], strides = [1, 1]} : vector<8x384xbf16> to vector<8x32xbf16>
    %113 = vector.extract_strided_slice %77 {offsets = [0, 192], sizes = [8, 32], strides = [1, 1]} : vector<8x384xbf16> to vector<8x32xbf16>
    %114 = vector.extract_strided_slice %77 {offsets = [0, 320], sizes = [8, 32], strides = [1, 1]} : vector<8x384xbf16> to vector<8x32xbf16>
    %cst_37 = arith.constant dense<0.000000e+00> : vector<8x8xf32>
    %115 = tpu.matmul %112, %113, %cst_37 {dimension_numbers = #tpu.dot_dimension_numbers<[1], [1], [0], [0], [0, 0, 1, 0], [], []>} : vector<8x32xbf16>, vector<8x32xbf16>, vector<8x8xf32> -> vector<8x8xf32>
    %cst_38 = arith.constant dense<0xFF800000> : vector<8xf32>
    %116 = vector.multi_reduction <maximumf>, %115, %cst_38 [1] : vector<8x8xf32> to vector<8xf32>
    %117 = vector.shape_cast %116 : vector<8xf32> to vector<8x1xf32>
    %118 = vector.broadcast %117 : vector<8x1xf32> to vector<8x8xf32>
    %119 = arith.subf %115, %118 : vector<8x8xf32>
    %120 = math.exp %119 : vector<8x8xf32>
    %cst_39 = arith.constant dense<0.000000e+00> : vector<8xf32>
    %121 = vector.multi_reduction <add>, %120, %cst_39 [1] : vector<8x8xf32> to vector<8xf32>
    %122 = vector.shape_cast %121 : vector<8xf32> to vector<8x1xf32>
    %123 = tpu.reciprocal %122 {approx = true} : vector<8x1xf32> -> vector<8x1xf32>
    %124 = vector.broadcast %123 : vector<8x1xf32> to vector<8x8xf32>
    %125 = arith.mulf %120, %124 : vector<8x8xf32>
    %126 = arith.truncf %125 : vector<8x8xf32> to vector<8x8xbf16>
    %cst_40 = arith.constant dense<0.000000e+00> : vector<8x32xf32>
    %127 = tpu.matmul %126, %114, %cst_40 {dimension_numbers = #tpu.dot_dimension_numbers<[1], [0], [0], [1], [0, 0, 1, 1], [], []>} : vector<8x8xbf16>, vector<8x32xbf16>, vector<8x32xf32> -> vector<8x32xf32>
    %c8_41 = arith.constant 8 : index
    %c64_42 = arith.constant 64 : index
    %128 = vector.load %arg15[%c8_41, %c64_42] : memref<16x128xf32, #tpu.memory_space<vmem>>, vector<8x32xf32>
    tpu.vector_store %arg15[%c8_41, %c64_42], %127 {strides = array<i32>} : memref<16x128xf32, #tpu.memory_space<vmem>>, vector<8x32xf32>,
    %129 = vector.extract_strided_slice %77 {offsets = [0, 96], sizes = [8, 32], strides = [1, 1]} : vector<8x384xbf16> to vector<8x32xbf16>
    %130 = vector.extract_strided_slice %77 {offsets = [0, 224], sizes = [8, 32], strides = [1, 1]} : vector<8x384xbf16> to vector<8x32xbf16>
    %131 = vector.extract_strided_slice %77 {offsets = [0, 352], sizes = [8, 32], strides = [1, 1]} : vector<8x384xbf16> to vector<8x32xbf16>
    %cst_43 = arith.constant dense<0.000000e+00> : vector<8x8xf32>
    %132 = tpu.matmul %129, %130, %cst_43 {dimension_numbers = #tpu.dot_dimension_numbers<[1], [1], [0], [0], [0, 0, 1, 0], [], []>} : vector<8x32xbf16>, vector<8x32xbf16>, vector<8x8xf32> -> vector<8x8xf32>
    %cst_44 = arith.constant dense<0xFF800000> : vector<8xf32>
    %133 = vector.multi_reduction <maximumf>, %132, %cst_44 [1] : vector<8x8xf32> to vector<8xf32>
    %134 = vector.shape_cast %133 : vector<8xf32> to vector<8x1xf32>
    %135 = vector.broadcast %134 : vector<8x1xf32> to vector<8x8xf32>
    %136 = arith.subf %132, %135 : vector<8x8xf32>
    %137 = math.exp %136 : vector<8x8xf32>
    %cst_45 = arith.constant dense<0.000000e+00> : vector<8xf32>
    %138 = vector.multi_reduction <add>, %137, %cst_45 [1] : vector<8x8xf32> to vector<8xf32>
    %139 = vector.shape_cast %138 : vector<8xf32> to vector<8x1xf32>
    %140 = tpu.reciprocal %139 {approx = true} : vector<8x1xf32> -> vector<8x1xf32>
    %141 = vector.broadcast %140 : vector<8x1xf32> to vector<8x8xf32>
    %142 = arith.mulf %137, %141 : vector<8x8xf32>
    %143 = arith.truncf %142 : vector<8x8xf32> to vector<8x8xbf16>
    %cst_46 = arith.constant dense<0.000000e+00> : vector<8x32xf32>
    %144 = tpu.matmul %143, %131, %cst_46 {dimension_numbers = #tpu.dot_dimension_numbers<[1], [0], [0], [1], [0, 0, 1, 1], [], []>} : vector<8x8xbf16>, vector<8x32xbf16>, vector<8x32xf32> -> vector<8x32xf32>
    %c8_47 = arith.constant 8 : index
    %c96_48 = arith.constant 96 : index
    %145 = vector.load %arg15[%c8_47, %c96_48] : memref<16x128xf32, #tpu.memory_space<vmem>>, vector<8x32xf32>
    tpu.vector_store %arg15[%c8_47, %c96_48], %144 {strides = array<i32>} : memref<16x128xf32, #tpu.memory_space<vmem>>, vector<8x32xf32>,
    %c0_49 = arith.constant 0 : index
    %c0_50 = arith.constant 0 : index
    %146 = vector.load %arg15[%c0_49, %c0_50] : memref<16x128xf32, #tpu.memory_space<vmem>>, vector<16x128xf32>
    %147 = arith.truncf %146 : vector<16x128xf32> to vector<16x128xbf16>
    %c0_51 = arith.constant 0 : index
    %c0_52 = arith.constant 0 : index
    %148 = vector.load %arg4[%c0_51, %c0_52] : memref<128x128xbf16, #tpu.memory_space<vmem>>, vector<128x128xbf16>
    %cst_53 = arith.constant dense<0.000000e+00> : vector<16x128xf32>
    %149 = tpu.matmul %147, %148, %cst_53 {dimension_numbers = #tpu.dot_dimension_numbers<[1], [0], [0], [1], [0, 0, 1, 1], [], []>} : vector<16x128xbf16>, vector<128x128xbf16>, vector<16x128xf32> -> vector<16x128xf32>
    %c0_54 = arith.constant 0 : index
    %c0_55 = arith.constant 0 : index
    %150 = vector.load %arg5[%c0_54, %c0_55] : memref<1x128xf32, #tpu.memory_space<vmem>>, vector<1x128xf32>
    %151 = vector.broadcast %150 : vector<1x128xf32> to vector<16x128xf32>
    %152 = arith.addf %149, %151 : vector<16x128xf32>
    %153 = arith.addf %0, %152 : vector<16x128xf32>
    %cst_56 = arith.constant dense<0.000000e+00> : vector<16xf32>
    %154 = vector.multi_reduction <add>, %153, %cst_56 [1] : vector<16x128xf32> to vector<16xf32>
    %155 = vector.shape_cast %154 : vector<16xf32> to vector<16x1xf32>
    %cst_57 = arith.constant 1.280000e+02 : f32
    %156 = vector.broadcast %cst_57 : f32 to vector<16x1xf32>
    %157 = arith.divf %155, %156 : vector<16x1xf32>
    %158 = vector.broadcast %157 : vector<16x1xf32> to vector<16x128xf32>
    %159 = arith.subf %153, %158 : vector<16x128xf32>
    %160 = arith.mulf %159, %159 : vector<16x128xf32>
    %cst_58 = arith.constant dense<0.000000e+00> : vector<16xf32>
    %161 = vector.multi_reduction <add>, %160, %cst_58 [1] : vector<16x128xf32> to vector<16xf32>
    %162 = vector.shape_cast %161 : vector<16xf32> to vector<16x1xf32>
    %cst_59 = arith.constant 1.280000e+02 : f32
    %163 = vector.broadcast %cst_59 : f32 to vector<16x1xf32>
    %164 = arith.divf %162, %163 : vector<16x1xf32>
    %165 = vector.broadcast %157 : vector<16x1xf32> to vector<16x128xf32>
    %166 = arith.subf %153, %165 : vector<16x128xf32>
    %cst_60 = arith.constant 9.99999974E-6 : f32
    %167 = vector.broadcast %cst_60 : f32 to vector<16x1xf32>
    %168 = arith.addf %164, %167 : vector<16x1xf32>
    %169 = math.rsqrt %168 : vector<16x1xf32>
    %170 = vector.broadcast %169 : vector<16x1xf32> to vector<16x128xf32>
    %171 = arith.mulf %166, %170 : vector<16x128xf32>
    %c0_61 = arith.constant 0 : index
    %c0_62 = arith.constant 0 : index
    %172 = vector.load %arg10[%c0_61, %c0_62] : memref<1x128xf32, #tpu.memory_space<vmem>>, vector<1x128xf32>
    %173 = vector.broadcast %172 : vector<1x128xf32> to vector<16x128xf32>
    %174 = arith.mulf %171, %173 : vector<16x128xf32>
    %c0_63 = arith.constant 0 : index
    %c0_64 = arith.constant 0 : index
    %175 = vector.load %arg11[%c0_63, %c0_64] : memref<1x128xf32, #tpu.memory_space<vmem>>, vector<1x128xf32>
    %176 = vector.broadcast %175 : vector<1x128xf32> to vector<16x128xf32>
    %177 = arith.addf %174, %176 : vector<16x128xf32>
    %178 = arith.truncf %177 : vector<16x128xf32> to vector<16x128xbf16>
    %c0_65 = arith.constant 0 : index
    %c0_66 = arith.constant 0 : index
    %179 = vector.load %arg6[%c0_65, %c0_66] : memref<128x256xbf16, #tpu.memory_space<vmem>>, vector<128x256xbf16>
    %cst_67 = arith.constant dense<0.000000e+00> : vector<16x256xf32>
    %180 = tpu.matmul %178, %179, %cst_67 {dimension_numbers = #tpu.dot_dimension_numbers<[1], [0], [0], [1], [0, 0, 1, 1], [], []>} : vector<16x128xbf16>, vector<128x256xbf16>, vector<16x256xf32> -> vector<16x256xf32>
    %c0_68 = arith.constant 0 : index
    %c0_69 = arith.constant 0 : index
    %181 = vector.load %arg7[%c0_68, %c0_69] : memref<1x256xf32, #tpu.memory_space<vmem>>, vector<1x256xf32>
    %182 = vector.broadcast %181 : vector<1x256xf32> to vector<16x256xf32>
    %183 = arith.addf %180, %182 : vector<16x256xf32>
    %cst_70 = arith.constant 0.000000e+00 : f32
    %184 = vector.broadcast %cst_70 : f32 to vector<16x256xf32>
    %185 = arith.maximumf %183, %184 : vector<16x256xf32>
    %186 = arith.truncf %185 : vector<16x256xf32> to vector<16x256xbf16>
    %c0_71 = arith.constant 0 : index
    %c0_72 = arith.constant 0 : index
    %187 = vector.load %arg8[%c0_71, %c0_72] : memref<256x128xbf16, #tpu.memory_space<vmem>>, vector<256x128xbf16>
    %cst_73 = arith.constant dense<0.000000e+00> : vector<16x128xf32>
    %188 = tpu.matmul %186, %187, %cst_73 {dimension_numbers = #tpu.dot_dimension_numbers<[1], [0], [0], [1], [0, 0, 1, 1], [], []>} : vector<16x256xbf16>, vector<256x128xbf16>, vector<16x128xf32> -> vector<16x128xf32>
    %c0_74 = arith.constant 0 : index
    %c0_75 = arith.constant 0 : index
    %189 = vector.load %arg9[%c0_74, %c0_75] : memref<1x128xf32, #tpu.memory_space<vmem>>, vector<1x128xf32>
    %190 = vector.broadcast %189 : vector<1x128xf32> to vector<16x128xf32>
    %191 = arith.addf %188, %190 : vector<16x128xf32>
    %192 = arith.addf %177, %191 : vector<16x128xf32>
    %cst_76 = arith.constant dense<0.000000e+00> : vector<16xf32>
    %193 = vector.multi_reduction <add>, %192, %cst_76 [1] : vector<16x128xf32> to vector<16xf32>
    %194 = vector.shape_cast %193 : vector<16xf32> to vector<16x1xf32>
    %cst_77 = arith.constant 1.280000e+02 : f32
    %195 = vector.broadcast %cst_77 : f32 to vector<16x1xf32>
    %196 = arith.divf %194, %195 : vector<16x1xf32>
    %197 = vector.broadcast %196 : vector<16x1xf32> to vector<16x128xf32>
    %198 = arith.subf %192, %197 : vector<16x128xf32>
    %199 = arith.mulf %198, %198 : vector<16x128xf32>
    %cst_78 = arith.constant dense<0.000000e+00> : vector<16xf32>
    %200 = vector.multi_reduction <add>, %199, %cst_78 [1] : vector<16x128xf32> to vector<16xf32>
    %201 = vector.shape_cast %200 : vector<16xf32> to vector<16x1xf32>
    %cst_79 = arith.constant 1.280000e+02 : f32
    %202 = vector.broadcast %cst_79 : f32 to vector<16x1xf32>
    %203 = arith.divf %201, %202 : vector<16x1xf32>
    %204 = vector.broadcast %196 : vector<16x1xf32> to vector<16x128xf32>
    %205 = arith.subf %192, %204 : vector<16x128xf32>
    %cst_80 = arith.constant 9.99999974E-6 : f32
    %206 = vector.broadcast %cst_80 : f32 to vector<16x1xf32>
    %207 = arith.addf %203, %206 : vector<16x1xf32>
    %208 = math.rsqrt %207 : vector<16x1xf32>
    %209 = vector.broadcast %208 : vector<16x1xf32> to vector<16x128xf32>
    %210 = arith.mulf %205, %209 : vector<16x128xf32>
    %c0_81 = arith.constant 0 : index
    %c0_82 = arith.constant 0 : index
    %211 = vector.load %arg12[%c0_81, %c0_82] : memref<1x128xf32, #tpu.memory_space<vmem>>, vector<1x128xf32>
    %212 = vector.broadcast %211 : vector<1x128xf32> to vector<16x128xf32>
    %213 = arith.mulf %210, %212 : vector<16x128xf32>
    %c0_83 = arith.constant 0 : index
    %c0_84 = arith.constant 0 : index
    %214 = vector.load %arg13[%c0_83, %c0_84] : memref<1x128xf32, #tpu.memory_space<vmem>>, vector<1x128xf32>
    %215 = vector.broadcast %214 : vector<1x128xf32> to vector<16x128xf32>
    %216 = arith.addf %213, %215 : vector<16x128xf32>
    %c0_85 = arith.constant 0 : index
    %c0_86 = arith.constant 0 : index
    %217 = vector.load %arg14[%c0_85, %c0_86] : memref<16x128xf32, #tpu.memory_space<vmem>>, vector<16x128xf32>
    tpu.vector_store %arg14[%c0_85, %c0_86], %216 {strides = array<i32>} : memref<16x128xf32, #tpu.memory_space<vmem>>, vector<16x128xf32>,
    return
  }
  func.func @transform_0(%arg0: i32) -> (i32, i32) {
    %c0_i32 = arith.constant 0 : i32
    %c0_i32_0 = arith.constant 0 : i32
    return %arg0, %c0_i32 : i32, i32
  }
  func.func @transform_1(%arg0: i32) -> (i32, i32) {
    %c0_i32 = arith.constant 0 : i32
    %c0_i32_0 = arith.constant 0 : i32
    %c0_i32_1 = arith.constant 0 : i32
    return %c0_i32, %c0_i32_0 : i32, i32
  }
  func.func @transform_2(%arg0: i32) -> (i32, i32) {
    %c0_i32 = arith.constant 0 : i32
    %c0_i32_0 = arith.constant 0 : i32
    %c0_i32_1 = arith.constant 0 : i32
    return %c0_i32, %c0_i32_0 : i32, i32
  }
  func.func @transform_3(%arg0: i32) -> (i32, i32) {
    %c0_i32 = arith.constant 0 : i32
    %c0_i32_0 = arith.constant 0 : i32
    %c0_i32_1 = arith.constant 0 : i32
    return %c0_i32, %c0_i32_0 : i32, i32
  }
  func.func @transform_4(%arg0: i32) -> (i32, i32) {
    %c0_i32 = arith.constant 0 : i32
    %c0_i32_0 = arith.constant 0 : i32
    %c0_i32_1 = arith.constant 0 : i32
    return %c0_i32, %c0_i32_0 : i32, i32
  }
  func.func @transform_5(%arg0: i32) -> (i32, i32) {
    %c0_i32 = arith.constant 0 : i32
    %c0_i32_0 = arith.constant 0 : i32
    %c0_i32_1 = arith.constant 0 : i32
    return %c0_i32, %c0_i32_0 : i32, i32
  }
  func.func @transform_6(%arg0: i32) -> (i32, i32) {
    %c0_i32 = arith.constant 0 : i32
    %c0_i32_0 = arith.constant 0 : i32
    %c0_i32_1 = arith.constant 0 : i32
    return %c0_i32, %c0_i32_0 : i32, i32
  }
  func.func @transform_7(%arg0: i32) -> (i32, i32) {
    %c0_i32 = arith.constant 0 : i32
    %c0_i32_0 = arith.constant 0 : i32
    %c0_i32_1 = arith.constant 0 : i32
    return %c0_i32, %c0_i32_0 : i32, i32
  }
  func.func @transform_8(%arg0: i32) -> (i32, i32) {
    %c0_i32 = arith.constant 0 : i32
    %c0_i32_0 = arith.constant 0 : i32
    %c0_i32_1 = arith.constant 0 : i32
    return %c0_i32, %c0_i32_0 : i32, i32
  }
  func.func @transform_9(%arg0: i32) -> (i32, i32) {
    %c0_i32 = arith.constant 0 : i32
    %c0_i32_0 = arith.constant 0 : i32
    %c0_i32_1 = arith.constant 0 : i32
    return %c0_i32, %c0_i32_0 : i32, i32
  }
  func.func @transform_10(%arg0: i32) -> (i32, i32) {
    %c0_i32 = arith.constant 0 : i32
    %c0_i32_0 = arith.constant 0 : i32
    %c0_i32_1 = arith.constant 0 : i32
    return %c0_i32, %c0_i32_0 : i32, i32
  }
  func.func @transform_11(%arg0: i32) -> (i32, i32) {
    %c0_i32 = arith.constant 0 : i32
    %c0_i32_0 = arith.constant 0 : i32
    %c0_i32_1 = arith.constant 0 : i32
    return %c0_i32, %c0_i32_0 : i32, i32
  }
  func.func @transform_12(%arg0: i32) -> (i32, i32) {
    %c0_i32 = arith.constant 0 : i32
    %c0_i32_0 = arith.constant 0 : i32
    %c0_i32_1 = arith.constant 0 : i32
    return %c0_i32, %c0_i32_0 : i32, i32
  }
  func.func @transform_13(%arg0: i32) -> (i32, i32) {
    %c0_i32 = arith.constant 0 : i32
    %c0_i32_0 = arith.constant 0 : i32
    return %arg0, %c0_i32 : i32, i32
  }
}

</mosaic_0001>

<bundles_post_ra>
// kernel: tpu_custom_call.1
= control target key start
LH: loop header
LB: loop body
LE: loop exit
PB: predicated region body
PF: predicated region fallthrough
CT: control target
= control target key end

     0   :  { %18 = vsyncpa [#allocation4], 0  ;;  %s2827_s0 = inlined_call_operand.hbm [shape: f32[16,128], index: 0, kind: input, shape index: {}]   ;;  %s2828_s1 = inlined_call_operand.hbm [shape: bf16[128,384], index: 1, kind: input, shape index: {}]   ;;  %s2829_s2 = inlined_call_operand.vmem [shape: f32[1,384], index: 2, kind: input, shape index: {}]   ;;  %s2830_s3 = inlined_call_operand.hbm [shape: bf16[128,128], index: 3, kind: input, shape index: {}]   ;;  %s2831_s4 = inlined_call_operand.vmem [shape: f32[1,128], index: 4, kind: input, shape index: {}]   ;;  %s2832_s5 = inlined_call_operand.hbm [shape: bf16[128,256], index: 5, kind: input, shape index: {}]   ;;  %s2833_s6 = inlined_call_operand.vmem [shape: f32[1,256], index: 6, kind: input, shape index: {}]   ;;  %s2834_s7 = inlined_call_operand.hbm [shape: bf16[256,128], index: 7, kind: input, shape index: {}]   ;;  %s2835_s8 = inlined_call_operand.vmem [shape: f32[1,128], index: 8, kind: input, shape index: {}]   ;;  %s2836_s9 = inlined_call_operand.vmem [shape: f32[1,128], index: 9, kind: input, shape index: {}]   ;;  %s2837_s10 = inlined_call_operand.vmem [shape: f32[1,128], index: 10, kind: input, shape index: {}]   ;;  %s2838_s11 = inlined_call_operand.vmem [shape: f32[1,128], index: 11, kind: input, shape index: {}]   ;;  %s2839_s12 = inlined_call_operand.vmem [shape: f32[1,128], index: 12, kind: input, shape index: {}]   ;;  %s2840_s13 = inlined_call_operand.hbm [shape: f32[16,128], index: 13, kind: output, shape index: {}]  }
   0x1   :  { %19 = vsyncpa [#allocation7], 0 }
   0x2   :  { %20 = vsyncpa [#allocation10], 0 }
   0x3   :  { %21 = vsyncpa [#allocation5], 0  ;;  %s2419_s25 = smov [#allocation6]   ;;  %s2279_s29 = scalar_lea.hbm %s2828_s1, 3072 }
   0x4   :  { %s39_s26 = sshll.u32 %s2419_s25, 4  ;;  %p2280_p0 = scmp.ne.s32.totalorder %s2828_s1, %s2279_s29  ;;  %s40_s26 = int_to_ptr.vmem [resolvable:$true] %s39_s26 }
   0x5   :  { %p2283_p1 = scmp.lt.u32.totalorder %s2279_s29, %s2828_s1 }
   0x7   :  { %p2285_p2 = pnand %p2283_p1, %p2280_p0 }
   0x9   :  { %2288 = shalt.err (!%p2285_p2)
}
   0xa   :  { %s2289_s17 = scalar_lea.vmem %s40_s26, 3072  ;;  %p2294_p4 = scmp.lt.s32.totalorder %s40_s26, %s40_s26 }
   0xb   :  { %p2290_p3 = scmp.ne.s32.totalorder %s40_s26, %s2289_s17  ;;  %p2295_p5 = scmp.lt.s32.totalorder %s2289_s17, %s2289_s17 }
   0xd   :  { %p2296_p6 = por %p2295_p5, %p2294_p4 }
   0xf   :  { %p2297_p7 = pnand %p2296_p6, %p2290_p3 }
  0x11   :  { %2300 = shalt.err (!%p2297_p7)
}
  0x12   :  { %s2420_s18 = smov 192   ;;  %s2421_s19 = smov 12  }
  0x13   :  { %45 = dma.hbm_to_vmem [thread:$0]  %s2828_s1, 3072, %s40_s26, [#allocation7], %s2420_s18, %s2420_s18, %s2421_s19  }
  0x14   :  { %s2422_s22 = smov [#allocation9]   ;;  %s2423_s24 = smov [#allocation3]  }
  0x15   :  { %s67_s23 = sshll.u32 %s2422_s22, 4  ;;  %s27_s25 = sshll.u32 %s2423_s24, 4  ;;  %s68_s23 = int_to_ptr.vmem [resolvable:$true] %s67_s23  ;;  %s28_s25 = int_to_ptr.vmem [resolvable:$true] %s27_s25 }
  0x16   :  { %s2301_s29 = scalar_lea.hbm %s2832_s5, 2048 }
  0x17   :  { %p2302_p8 = scmp.ne.s32.totalorder %s2832_s5, %s2301_s29  ;;  %p2305_p9 = scmp.lt.u32.totalorder %s2301_s29, %s2832_s5 }
  0x19   :  { %p2307_p10 = pnand %p2305_p9, %p2302_p8 }
  0x1b   :  { %2310 = shalt.err (!%p2307_p10)
}
  0x1c   :  { %s2311_s1 = scalar_lea.vmem %s68_s23, 2048  ;;  %p2316_p12 = scmp.lt.s32.totalorder %s68_s23, %s68_s23 }
  0x1d   :  { %p2312_p11 = scmp.ne.s32.totalorder %s68_s23, %s2311_s1  ;;  %p2317_p13 = scmp.lt.s32.totalorder %s2311_s1, %s2311_s1 }
  0x1f   :  { %p2318_p0 = por %p2317_p13, %p2316_p12 }
  0x21   :  { %p2319_p1 = pnand %p2318_p0, %p2312_p11 }
  0x23   :  { %2322 = shalt.err (!%p2319_p1)
}
  0x24   :  { %s2424_s26 = smov 128   ;;  %s2425_s17 = smov 8  }
  0x25   :  { %73 = dma.hbm_to_vmem [thread:$0]  %s2832_s5, 2048, %s68_s23, [#allocation10], %s2424_s26, %s2424_s26, %s2425_s17  }
  0x26   :  { %s2323_s22 = scalar_lea.hbm %s2827_s0, 256 }
  0x27   :  { %p2324_p2 = scmp.ne.s32.totalorder %s2827_s0, %s2323_s22  ;;  %p2327_p3 = scmp.lt.u32.totalorder %s2323_s22, %s2827_s0 }
  0x29   :  { %p2329_p4 = pnand %p2327_p3, %p2324_p2 }
  0x2b   :  { %2332 = shalt.err (!%p2329_p4)
}
  0x2c   :  { %s2333_s30 = scalar_lea.vmem %s28_s25, 256  ;;  %p2338_p6 = scmp.lt.s32.totalorder %s28_s25, %s28_s25 }
  0x2d   :  { %p2334_p5 = scmp.ne.s32.totalorder %s28_s25, %s2333_s30  ;;  %p2339_p7 = scmp.lt.s32.totalorder %s2333_s30, %s2333_s30 }
  0x2f   :  { %p2340_p8 = por %p2339_p7, %p2338_p6 }
  0x31   :  { %p2341_p9 = pnand %p2340_p8, %p2334_p5 }
  0x33   :  { %2344 = shalt.err (!%p2341_p9)
}
  0x34   :  { %33 = dma.hbm_to_vmem [thread:$0]  %s2827_s0, 256, %s28_s25, [#allocation4], %s2424_s26, %s2424_s26, %s2425_s17  }
  0x35   :  { %s2426_s14 = smov [#allocation8]   ;;  %s2345_s18 = scalar_lea.hbm %s2830_s3, 1024 }
  0x36   :  { %s53_s15 = sshll.u32 %s2426_s14, 4  ;;  %p2346_p10 = scmp.ne.s32.totalorder %s2830_s3, %s2345_s18  ;;  %s54_s15 = int_to_ptr.vmem [resolvable:$true] %s53_s15 }
  0x37   :  { %p2349_p11 = scmp.lt.u32.totalorder %s2345_s18, %s2830_s3 }
  0x39   :  { %p2351_p12 = pnand %p2349_p11, %p2346_p10 }
  0x3b   :  { %2354 = shalt.err (!%p2351_p12)
}
  0x3c   :  { %s2355_s24 = scalar_lea.vmem %s54_s15, 1024  ;;  %p2360_p0 = scmp.lt.s32.totalorder %s54_s15, %s54_s15 }
  0x3d   :  { %p2356_p13 = scmp.ne.s32.totalorder %s54_s15, %s2355_s24  ;;  %p2361_p1 = scmp.lt.s32.totalorder %s2355_s24, %s2355_s24 }
  0x3f   :  { %p2362_p2 = por %p2361_p1, %p2360_p0 }
  0x41   :  { %p2363_p3 = pnand %p2362_p2, %p2356_p13 }
  0x43   :  { %2366 = shalt.err (!%p2363_p3)
}
  0x44   :  { %s2427_s0 = smov 64   ;;  %s2428_s25 = smov 4  }
  0x45   :  { %59 = dma.hbm_to_vmem [thread:$0]  %s2830_s3, 1024, %s54_s15, [#allocation7], %s2427_s0, %s2427_s0, %s2428_s25  }
  0x46   :  { %s2429_s29 = smov [#allocation11]   ;;  %s2367_s14 = scalar_lea.hbm %s2834_s7, 2048 }
  0x47   :  { %s81_s30 = sshll.u32 %s2429_s29, 4  ;;  %p2368_p4 = scmp.ne.s32.totalorder %s2834_s7, %s2367_s14  ;;  %s82_s30 = int_to_ptr.vmem [resolvable:$true] %s81_s30 }
  0x48   :  { %p2371_p5 = scmp.lt.u32.totalorder %s2367_s14, %s2834_s7 }
  0x4a   :  { %p2373_p6 = pnand %p2371_p5, %p2368_p4 }
  0x4c   :  { %2376 = shalt.err (!%p2373_p6)
}
  0x4d   :  { %s2377_s20 = scalar_lea.vmem %s82_s30, 2048  ;;  %p2382_p8 = scmp.lt.s32.totalorder %s82_s30, %s82_s30 }
  0x4e   :  { %p2378_p7 = scmp.ne.s32.totalorder %s82_s30, %s2377_s20  ;;  %p2383_p9 = scmp.lt.s32.totalorder %s2377_s20, %s2377_s20 }
  0x50   :  { %p2384_p10 = por %p2383_p9, %p2382_p8 }
  0x52   :  { %p2385_p11 = pnand %p2384_p10, %p2378_p7 }
  0x54   :  { %2388 = shalt.err (!%p2385_p11)
}
  0x55   :  { %87 = dma.hbm_to_vmem [thread:$0]  %s2834_s7, 2048, %s82_s30, [#allocation10], %s2427_s0, %s2427_s0, %s2428_s25  }
  0x56   :  { %2411 = dma.done.wait [#allocation4], 256  }
  0x57   :  { %2412 = vsyncadd [#allocation4], 4294967040 }
  0x58   :  { %2413 = dma.done.wait [#allocation7], 4096  }
  0x59   :  { %2414 = vsyncadd [#allocation7], 4294963200 }
  0x5a   :  { %2415 = dma.done.wait [#allocation10], 4096  }
  0x5b   :  { %2416 = vsyncadd [#allocation10], 4294963200  ;;  %v2430_v0 = vmov 0   ;;  %v2431_v1 = vmov 0.0   ;;  %v2159_v2 = vld [vmem:[#allocation6 + $0x4] ss:$12 sps:$4 sm:$0xff]   ;;  %v151_v29 = vlaneseq }
  0x5c   :  { %326 = vmatprep.mubr.bf16.mxu0 %v2430_v0  ;;  %2006 = vmatprep.subr.bf16.mxu1 %v2431_v1  ;;  %v2161_v3 = vld [vmem:[#allocation6] ss:$12 sps:$4 sm:$0xff]   ;;  %v2162_v4 = vld [vmem:[#allocation6 + $0x1c] ss:$12 sps:$4 sm:$0xff]   ;;  %v2164_v5 = vld [vmem:[#allocation6 + $0x18] ss:$12 sps:$4 sm:$0xff]  }
  0x5d   :  { %294 = vmatprep.subr.bf16.mxu0 %v2159_v2  ;;  %v2165_v6 = vld [vmem:[#allocation6 + $0x34] ss:$12 sps:$4 sm:$0xff]   ;;  %v2167_v7 = vld [vmem:[#allocation6 + $0x30] ss:$12 sps:$4 sm:$0xff]   ;;  %v2168_v8 = vld [vmem:[#allocation6 + $0x4c] ss:$12 sps:$4 sm:$0xff]  }
  0x5e   :  { %295 = vmatpush1.bf16.msra.mxu0 %v2161_v3  ;;  %v2170_v9 = vld [vmem:[#allocation6 + $0x48] ss:$12 sps:$4 sm:$0xff]   ;;  %v2171_v10 = vld [vmem:[#allocation6 + $0x64] ss:$12 sps:$4 sm:$0xff]   ;;  %v2184_v12 = vld [vmem:[#allocation6 + $0x20] ss:$12 sps:$4 sm:$0xff]  }
  0x5f   :  { %296 = vmatprep.subr.bf16.mxu0 %v2162_v4  ;;  %v2183_v11 = vld [vmem:[#allocation6 + $0x8] ss:$12 sps:$4 sm:$0xff]   ;;  %v2173_v13 = vld [vmem:[#allocation6 + $0x60] ss:$12 sps:$4 sm:$0xff]   ;;  %v2176_v15 = vld [vmem:[#allocation6 + $0x78] ss:$12 sps:$4 sm:$0xff]  }
  0x60   :  { %2007 = vmatpush3.bf16.msra.mxu1 %v2183_v11  ;;  %v2174_v14 = vld [vmem:[#allocation6 + $0x7c] ss:$12 sps:$4 sm:$0xff]   ;;  %v2177_v16 = vld [vmem:[#allocation6 + $0x94] ss:$12 sps:$4 sm:$0xff]   ;;  %v2185_v17 = vld [vmem:[#allocation6 + $0x38] ss:$12 sps:$4 sm:$0xff]  }
  0x61   :  { %2008 = vmatprep.subr.bf16.mxu1 %v2431_v1  ;;  %v2186_v18 = vld [vmem:[#allocation6 + $0x50] ss:$12 sps:$4 sm:$0xff]   ;;  %v2180_v20 = vld [vmem:[#allocation6 + $0xac] ss:$12 sps:$4 sm:$0xff]   ;;  %v2187_v21 = vld [vmem:[#allocation6 + $0x68] ss:$12 sps:$4 sm:$0xff]  }
  0x62   :  { %297 = vmatpush1.bf16.msra.mxu0 %v2164_v5  ;;  %v2179_v19 = vld [vmem:[#allocation6 + $0x90] ss:$12 sps:$4 sm:$0xff]   ;;  %v2182_v22 = vld [vmem:[#allocation6 + $0xa8] ss:$12 sps:$4 sm:$0xff]   ;;  %v2188_v25 = vld [vmem:[#allocation6 + $0x80] ss:$12 sps:$4 sm:$0xff]  }
  0x63   :  { %298 = vmatprep.subr.bf16.mxu0 %v2165_v6  ;;  %v2581_v23 = vld [vmem:[#allocation3] sm:$0xff]  ;;  %v2583_v24 = vld [vmem:[#allocation3 + $0x8] sm:$0xff]  ;;  %vm2432_vm0 = vmmov 0   ;;  %v2599_v30 = vshrl.u32 %v151_v29, 7  ;;  %v149_v32 = vld [vmem:[%s2829_s2] sm:$0x7] }
  0x64   :  { %2009 = vmatpush3.bf16.msra.mxu1 %v2184_v12  ;;  %v116_v26 = vpack.c.bf16 %v2583_v24, %v2581_v23  ;;  %v2189_v27 = vld [vmem:[#allocation6 + $0x98] ss:$12 sps:$4 sm:$0xff]   ;;  %v2190_v28 = vld [vmem:[#allocation6 + $0xb0] ss:$12 sps:$4 sm:$0xff]   ;;  %2022 = vmatprep.mubr.msk.bf16.mxu1 %vm2432_vm0, %v2431_v1  ;;  %vm381_vm1 = vcmask 261120   ;;  %s2433_s2 = smov 96  }
  0x65   :  { %2010 = vmatprep.subr.bf16.mxu1 %v2431_v1  ;;  %v153_v31 = vsub.s32 0, %v2599_v30  ;;  %v157_v33 = vsub.s32 1, %v2599_v30  ;;  %s2434_s22 = smov 32   ;;  %v161_v49 = vsub.s32 2, %v2599_v30  ;;  %vm444_vm2 = vcmask 1043456   ;;  %s2435_s14 = smov [#allocation12]  }
  0x66   :  { %299 = vmatpush1.bf16.msra.mxu0 %v2167_v7  ;;  %vm428_vm3 = vcmask 64512   ;;  %vm606_vm4 = vcmask 523520   ;;  %vm722_vm5 = vcmask 785920   ;;  %vm838_vm6 = vcmask 1048320   ;;  %v1915_v30 = vld [vmem:[%s2835_s8] ss:$0 sm:$0xff] }
  0x67   :  { %300 = vmatprep.subr.bf16.mxu0 %v2168_v8  ;;  %v154_v34 = vrot.slane %v149_v32, %v153_v31  ;;  %v158_v36 = vrot.slane %v149_v32, %v157_v33  ;;  %v162_v50 = vrot.slane %v149_v32, %v161_v49  ;;  %s1834_s16 = sshll.u32 %s2435_s14, 4  ;;  %s1835_s16 = int_to_ptr.vmem [resolvable:$true] %s1834_s16 }
  0x68   :  { %2011 = vmatpush3.bf16.msra.mxu1 %v2185_v17  ;;  %s2389_s1 = scalar_lea.vmem %s1835_s16, 256  ;;  %p2394_p13 = scmp.lt.s32.totalorder %s1835_s16, %s1835_s16 }
  0x69   :  { %2012 = vmatprep.subr.bf16.mxu1 %v2431_v1  ;;  %p2390_p12 = scmp.ne.s32.totalorder %s1835_s16, %s2389_s1  ;;  %p2395_p0 = scmp.lt.s32.totalorder %s2389_s1, %s2389_s1 }
  0x6a   :  { %301 = vmatpush1.bf16.msra.mxu0 %v2170_v9 }
  0x6b   :  { %302 = vmatprep.subr.bf16.mxu0 %v2171_v10  ;;  %p2396_p1 = por %p2395_p0, %p2394_p13 }
  0x6c   :  { %2013 = vmatpush3.bf16.msra.mxu1 %v2186_v18 }
  0x6d   :  { %2014 = vmatprep.subr.bf16.mxu1 %v2431_v1  ;;  %p2397_p2 = pnand %p2396_p1, %p2390_p12 }
  0x6e   :  { %303 = vmatpush1.bf16.msra.mxu0 %v2173_v13 }
  0x6f   :  { %304 = vmatprep.subr.bf16.mxu0 %v2174_v14 }
  0x70   :  { %2015 = vmatpush3.bf16.msra.mxu1 %v2187_v21 }
  0x71   :  { %2016 = vmatprep.subr.bf16.mxu1 %v2431_v1 }
  0x72   :  { %305 = vmatpush1.bf16.msra.mxu0 %v2176_v15 }
  0x73   :  { %306 = vmatprep.subr.bf16.mxu0 %v2177_v16 }
  0x74   :  { %2017 = vmatpush3.bf16.msra.mxu1 %v2188_v25 }
  0x75   :  { %2018 = vmatprep.subr.bf16.mxu1 %v2431_v1 }
  0x76   :  { %307 = vmatpush1.bf16.msra.mxu0 %v2179_v19 }
  0x77   :  { %308 = vmatprep.subr.bf16.mxu0 %v2180_v20 }
  0x78   :  { %2019 = vmatpush3.bf16.msra.mxu1 %v2189_v27 }
  0x79   :  { %2020 = vmatprep.subr.bf16.mxu1 %v2431_v1 }
  0x7a   :  { %309 = vmatpush1.bf16.msra.mxu0 %v2182_v22 }
  0x7b   :  { %2050 = vmatprep.subr.bf16.mxu0 %v2431_v1 }
  0x7c   :  { %2021 = vmatpush3.bf16.msra.mxu1 %v2190_v28 }
  0x7d   :  { %327 = vmatmul.mubr.bf16.vlgmr.msra.gmra.mrb[0].mxu0 %v116_v26  ;;  %2026 = vmatprep.subr.bf16.mxu1 %v2431_v1 }
  0x7e   :  { %2052 = vmatprep.mubr.msk.bf16.mxu0 %vm2432_vm0, %v2431_v1 }
  0x7f   :  { %2023 = vmatmul.mubr.bf16.vlgmr.msra.gmra.mrb[0].mxu1 %v116_v26 }
  0x80   :  { %2028 = vmatprep.mubr.msk.bf16.mxu1 %vm2432_vm0, %v2431_v1 }
 0x150   :  { %v328_v35 = vpop.f32.mrb[0].mxu0 }
 0x151   :  { %v330_v37 = vpop.f32.mrb[1].mxu0  ;;  %v329_v39 = vadd.f32 %v328_v35, %v154_v34 }
 0x152   :  { %v332_v38 = vpop.f32.mrb[2].mxu0  ;;  %v331_v42 = vadd.f32 %v330_v37, %v158_v36  ;;  %v371_v51 = vpop.f32.mrb[0].mxu1 }
 0x153   :  { %v333_v40 = vadd.f32 %v332_v38, %v154_v34  ;;  %v334_v41 = vpop.f32.mrb[3].mxu0  ;;  %v372_v52 = vadd.f32 %v371_v51, %v162_v50  ;;  %v2024_v53 = vpop.f32.mrb[1].mxu1 }
 0x154   :  { %v335_v43 = vadd.f32 %v334_v41, %v158_v36  ;;  %v374_v54 = vpop.f32.mrb[2].mxu1 }
 0x155   :  { %v378_v44 = vpack.c.bf16 %v333_v40, %v329_v39  ;;  %v375_v55 = vadd.f32 %v374_v54, %v162_v50  ;;  %v2025_v56 = vpop.f32.mrb[3].mxu1 }
 0x156   :  { %v379_v45 = vpack.c.bf16 %v335_v43, %v331_v42 }
 0x157   :  { %v2621_v48 = vrot.slane %v378_v44, 4  ;;  %v2628_v57 = vpack.c.bf16 %v375_v55, %v372_v52 }
 0x158   :  { %493 = vrot.lane.b32.xlu1 %v379_v45, %s2433_s2  ;;  %v386_v46 = vsel %vm381_vm1, %v379_v45, 0  ;;  %v841_v47 = vrot.slane %v379_v45, 4 }
 0x159   :  { %2027 = vmatpush3.bf16.xpose.msra.mxu1 %v386_v46  ;;  %v446_v58 = vsel %vm444_vm2, %v2628_v57, 0 }
 0x15a   :  { %2032 = vmatprep.subr.bf16.mxu1 %v2431_v1  ;;  %v846_v20 = vsel %vm381_vm1, %v841_v47, 0 }
 0x15c   :  { %490 = vrot.lane.b32.xlu1 %v378_v44, %s2433_s2 }
 0x160   :  { %608 = vrot.lane.b32.xlu1 %v378_v44, %s2427_s0  ;;  %2029 = vmatmul.mubr.msk.bf16.vlgmr.msra.gmra.mrb[4].mxu1 %vm381_vm1, %v378_v44 }
 0x161   :  { %2034 = vmatprep.mubr.msk.bf16.mxu1 %vm2432_vm0, %v2431_v1  ;;  %2033 = vmatpush3.bf16.msra.mxu1 %v446_v58 }
 0x162   :  { %2038 = vmatprep.subr.bf16.mxu1 %v2431_v1 }
 0x164   :  { %726 = vrot.lane.b32.xlu1 %v379_v45, %s2434_s22 }
 0x168   :  { %724 = vrot.lane.b32.xlu1 %v378_v44, %s2434_s22 }
 0x16c   :  { %950 = vrot.lane.b32.xlu1 %v841_v47, %s2433_s2 }
 0x170   :  { %948 = vrot.lane.b32.xlu1 %v2621_v48, %s2433_s2 }
 0x174   :  { %1065 = vrot.lane.b32.xlu1 %v841_v47, %s2427_s0 }
 0x178   :  { %1180 = vrot.lane.b32.xlu1 %v841_v47, %s2434_s22 }
 0x1ca   :  { %v494_v7 = vpop.permute.xlu1 %493 }
 0x1cb   :  { %v499_v18 = vsel %vm381_vm1, %v494_v7, 0 }
 0x1ce   :  { %v491_v8 = vpop.permute.xlu1 %490 }
 0x1d2   :  { %v609_v10 = vpop.permute.xlu1 %608 }
 0x1d6   :  { %v727_v13 = vpop.permute.xlu1 %726 }
 0x1d7   :  { %v732_v16 = vsel %vm381_vm1, %v727_v13, 0 }
 0x1da   :  { %v725_v19 = vpop.permute.xlu1 %724 }
 0x1de   :  { %v951_v21 = vpop.permute.xlu1 %950 }
 0x1df   :  { %v956_v25 = vsel %vm381_vm1, %v951_v21, 0 }
 0x1e2   :  { %v949_v22 = vpop.permute.xlu1 %948 }
 0x1e6   :  { %v1066_v26 = vpop.permute.xlu1 %1065 }
 0x1e7   :  { %v1071_v27 = vsel %vm381_vm1, %v1066_v26, 0 }
 0x1ea   :  { %v1181_v28 = vpop.permute.xlu1 %1180 }
 0x1eb   :  { %v1186_v32 = vsel %vm381_vm1, %v1181_v28, 0 }
 0x233   :  { %v422_v59 = vpop.f32.mrb[4].mxu1 }
 0x234   :  { %v2030_v60 = vpop.f32.mrb[5].mxu1  ;;  %v429_v61 = vsel %vm428_vm3, %v422_v59, -inf }
 0x235   :  { %430 = vmax.xlane.f32.xlu0 %v429_v61  ;;  %v425_v62 = vpop.f32.mrb[6].mxu1 }
 0x236   :  { %v2031_v63 = vpop.f32.mrb[7].mxu1 }
 0x2c2   :  { %v431_v2 = vpop.xlane.xlu0 %430 }
 0x2c3   :  { %v432_v3 = vsub.f32 %v422_v59, %v431_v2 }
 0x2c5   :  { %v433_v4 = vmul.f32 1.442695, %v432_v3 }
 0x2c7   :  { %2239 = vpow2.f32 %v433_v4 }
 0x2d1   :  { %v2240_v5 = vpop.eup %2239 }
 0x2d2   :  { %v435_v6 = vsel %vm428_vm3, %v2240_v5, 0.0 }
 0x2d3   :  { %436 = vadd.xlane.f32.xlu0 %v435_v6 }
 0x2e9   :  { %610 = vrot.lane.b32.xlu0 %v379_v45, %s2427_s0 }
 0x2ed   :  { %1063 = vrot.lane.b32.xlu0 %v2621_v48, %s2427_s0 }
 0x2f1   :  { %1178 = vrot.lane.b32.xlu0 %v2621_v48, %s2434_s22 }
 0x360   :  { %v437_v9 = vpop.xlane.xlu0 %436 }
 0x361   :  { %2241 = vrcp.f32 %v437_v9 }
 0x364   :  { %v611_v11 = vpop.permute.xlu0 %610 }
 0x365   :  { %v616_v12 = vsel %vm381_vm1, %v611_v11, 0 }
 0x366   :  { %2051 = vmatpush3.bf16.xpose.msra.mxu0 %v616_v12 }
 0x367   :  { %2062 = vmatprep.subr.bf16.mxu0 %v2431_v1 }
 0x368   :  { %v1064_v29 = vpop.permute.xlu0 %1063 }
 0x36b   :  { %v2242_v14 = vpop.eup %2241 }
 0x36c   :  { %v439_v15 = vmul.f32 %v2242_v14, %v2240_v5  ;;  %v1179_v34 = vpop.permute.xlu0 %1178 }
 0x36d   :  { %2053 = vmatmul.mubr.msk.bf16.vlgmr.msra.gmra.mrb[4].mxu0 %vm381_vm1, %v609_v10 }
 0x36e   :  { %2063 = vmatpush3.bf16.xpose.msra.mxu0 %v732_v16  ;;  %v440_v17 = vpack.c.bf16 %v439_v15, %v439_v15  ;;  %2064 = vmatprep.mubr.msk.bf16.mxu0 %vm2432_vm0, %v2431_v1 }
 0x36f   :  { %2074 = vmatprep.subr.bf16.mxu0 %v2431_v1 }
 0x370   :  { %2035 = vmatmul.mubr.msk.bf16.vlgmr.msra.gmra.mrb[8].mxu1 %vm428_vm3, %v440_v17 }
 0x371   :  { %2039 = vmatpush3.bf16.xpose.msra.mxu1 %v499_v18  ;;  %2040 = vmatprep.mubr.msk.bf16.mxu1 %vm2432_vm0, %v2431_v1 }
 0x372   :  { %2044 = vmatprep.subr.bf16.mxu1 %v2431_v1 }
 0x375   :  { %2065 = vmatmul.mubr.msk.bf16.vlgmr.msra.gmra.mrb[8].mxu0 %vm381_vm1, %v725_v19 }
 0x376   :  { %2075 = vmatpush3.bf16.xpose.msra.mxu0 %v846_v20  ;;  %2076 = vmatprep.mubr.msk.bf16.mxu0 %vm2432_vm0, %v2431_v1 }
 0x377   :  { %2086 = vmatprep.subr.bf16.mxu0 %v2431_v1 }
 0x378   :  { %2041 = vmatmul.mubr.msk.bf16.vlgmr.msra.gmra.mrb[12].mxu1 %vm381_vm1, %v491_v8 }
 0x379   :  { %2046 = vmatprep.mubr.msk.bf16.mxu1 %vm2432_vm0, %v2431_v1 }
 0x37d   :  { %2077 = vmatmul.mubr.msk.bf16.vlgmr.msra.gmra.mrb[12].mxu0 %vm381_vm1, %v2621_v48 }
 0x37e   :  { %2087 = vmatpush3.bf16.xpose.msra.mxu0 %v956_v25  ;;  %2088 = vmatprep.mubr.msk.bf16.mxu0 %vm2432_vm0, %v2431_v1 }
 0x37f   :  { %2098 = vmatprep.subr.bf16.mxu0 %v2431_v1 }
 0x385   :  { %2089 = vmatmul.mubr.msk.bf16.vlgmr.msra.gmra.mrb[16].mxu0 %vm381_vm1, %v949_v22 }
 0x386   :  { %2099 = vmatpush3.bf16.xpose.msra.mxu0 %v1071_v27  ;;  %2100 = vmatprep.mubr.msk.bf16.mxu0 %vm2432_vm0, %v2431_v1 }
 0x387   :  { %2110 = vmatprep.subr.bf16.mxu0 %v2431_v1 }
 0x38d   :  { %2101 = vmatmul.mubr.msk.bf16.vlgmr.msra.gmra.mrb[20].mxu0 %vm381_vm1, %v1064_v29 }
 0x38e   :  { %2111 = vmatpush3.bf16.xpose.msra.mxu0 %v1186_v32  ;;  %2112 = vmatprep.mubr.msk.bf16.mxu0 %vm2432_vm0, %v2431_v1 }
 0x38f   :  { %2122 = vmatprep.subr.bf16.mxu0 %v2431_v1 }
 0x395   :  { %2113 = vmatmul.mubr.msk.bf16.vlgmr.msra.gmra.mrb[24].mxu0 %vm381_vm1, %v1179_v34 }
 0x396   :  { %2138 = vmatprep.mubr.msk.bf16.mxu0 %vm2432_vm0, %v2431_v1 }
 0x440   :  { %v652_v35 = vpop.f32.mrb[4].mxu0 }
 0x441   :  { %v2054_v36 = vpop.f32.mrb[5].mxu0  ;;  %v658_v37 = vsel %vm428_vm3, %v652_v35, -inf }
 0x442   :  { %659 = vmax.xlane.f32.xlu0 %v658_v37  ;;  %v655_v38 = vpop.f32.mrb[6].mxu0 }
 0x443   :  { %v482_v39 = vpop.f32.mrb[8].mxu1  ;;  %v2055_v40 = vpop.f32.mrb[7].mxu0 }
 0x444   :  { %488 = vst.msk [vmem:[#allocation2] sm:$0xff] %vm381_vm1, %v482_v39  ;;  %v2036_v41 = vpop.f32.mrb[9].mxu1 }
 0x445   :  { %v485_v42 = vpop.f32.mrb[10].mxu1 }
 0x446   :  { %v2037_v43 = vpop.f32.mrb[11].mxu1 }
 0x448   :  { %v768_v44 = vpop.f32.mrb[8].mxu0 }
 0x449   :  { %v2066_v45 = vpop.f32.mrb[9].mxu0  ;;  %v774_v46 = vsel %vm428_vm3, %v768_v44, -inf }
 0x44a   :  { %775 = vmax.xlane.f32.xlu0 %v774_v46  ;;  %v771_v47 = vpop.f32.mrb[10].mxu0 }
 0x44b   :  { %v535_v48 = vpop.f32.mrb[12].mxu1  ;;  %v2067_v49 = vpop.f32.mrb[11].mxu0 }
 0x44c   :  { %v2042_v50 = vpop.f32.mrb[13].mxu1  ;;  %v541_v51 = vsel %vm428_vm3, %v535_v48, -inf }
 0x44d   :  { %542 = vmax.xlane.f32.xlu1 %v541_v51  ;;  %v538_v52 = vpop.f32.mrb[14].mxu1 }
 0x44e   :  { %v2043_v53 = vpop.f32.mrb[15].mxu1 }
 0x44f   :  { %v900_v53 = vrot.slane %v2628_v57, 4 }
 0x450   :  { %v882_v54 = vpop.f32.mrb[12].mxu0 }
 0x451   :  { %v2078_v55 = vpop.f32.mrb[13].mxu0  ;;  %v888_v56 = vsel %vm428_vm3, %v882_v54, -inf }
 0x452   :  { %v885_v58 = vpop.f32.mrb[14].mxu0  ;;  %889 = vmax.xlane.f32.xlu1 %v888_v56 }
 0x453   :  { %v2079_v59 = vpop.f32.mrb[15].mxu0 }
 0x458   :  { %v992_v60 = vpop.f32.mrb[16].mxu0 }
 0x459   :  { %v2090_v61 = vpop.f32.mrb[17].mxu0  ;;  %v998_v62 = vsel %vm428_vm3, %v992_v60, -inf }
 0x45a   :  { %999 = vmax.xlane.f32.xlu0 %v998_v62  ;;  %v995_v63 = vpop.f32.mrb[18].mxu0 }
 0x45b   :  { %v2091_v2 = vpop.f32.mrb[19].mxu0 }
 0x460   :  { %v1107_v3 = vpop.f32.mrb[20].mxu0 }
 0x461   :  { %v2102_v4 = vpop.f32.mrb[21].mxu0  ;;  %v1113_v5 = vsel %vm428_vm3, %v1107_v3, -inf }
 0x462   :  { %v1110_v6 = vpop.f32.mrb[22].mxu0  ;;  %1114 = vmax.xlane.f32.xlu1 %v1113_v5 }
 0x463   :  { %v2103_v7 = vpop.f32.mrb[23].mxu0 }
 0x468   :  { %v1222_v8 = vpop.f32.mrb[24].mxu0 }
 0x469   :  { %v2114_v9 = vpop.f32.mrb[25].mxu0  ;;  %v1228_v10 = vsel %vm428_vm3, %v1222_v8, -inf }
 0x46a   :  { %1229 = vmax.xlane.f32.xlu0 %v1228_v10  ;;  %v1225_v11 = vpop.f32.mrb[26].mxu0 }
 0x46b   :  { %v2115_v12 = vpop.f32.mrb[27].mxu0 }
 0x4cf   :  { %v660_v13 = vpop.xlane.xlu0 %659 }
 0x4d0   :  { %v661_v14 = vsub.f32 %v652_v35, %v660_v13  ;;  %v905_v13 = vsel %vm444_vm2, %v900_v53, 0 }
 0x4d2   :  { %v662_v15 = vmul.f32 1.442695, %v661_v14 }
 0x4d4   :  { %2243 = vpow2.f32 %v662_v15 }
 0x4d7   :  { %v776_v16 = vpop.xlane.xlu0 %775 }
 0x4d8   :  { %v777_v17 = vsub.f32 %v768_v44, %v776_v16 }
 0x4da   :  { %v778_v18 = vmul.f32 1.442695, %v777_v17  ;;  %v543_v19 = vpop.xlane.xlu1 %542 }
 0x4db   :  { %v544_v20 = vsub.f32 %v535_v48, %v543_v19 }
 0x4dc   :  { %2245 = vpow2.f32 %v778_v18 }
 0x4dd   :  { %v545_v21 = vmul.f32 1.442695, %v544_v20 }
 0x4de   :  { %v2687_v22 = vpop.eup %2243 }
 0x4df   :  { %2247 = vpow2.f32 %v545_v21  ;;  %v890_v25 = vpop.xlane.xlu1 %889  ;;  %v664_v26 = vsel %vm428_vm3, %v2687_v22, 0.0 }
 0x4e0   :  { %v891_v27 = vsub.f32 %v882_v54, %v890_v25  ;;  %665 = vadd.xlane.f32.xlu0 %v664_v26 }
 0x4e2   :  { %v892_v28 = vmul.f32 1.442695, %v891_v27 }
 0x4e4   :  { %2249 = vpow2.f32 %v892_v28 }
 0x4e6   :  { %v2691_v29 = vpop.eup %2245 }
 0x4e7   :  { %v1000_v32 = vpop.xlane.xlu0 %999  ;;  %v780_v34 = vsel %vm428_vm3, %v2691_v29, 0.0 }
 0x4e8   :  { %v1001_v35 = vsub.f32 %v992_v60, %v1000_v32  ;;  %781 = vadd.xlane.f32.xlu1 %v780_v34 }
 0x4e9   :  { %v2248_v36 = vpop.eup %2247 }
 0x4ea   :  { %v1002_v37 = vmul.f32 1.442695, %v1001_v35  ;;  %v547_v38 = vsel %vm428_vm3, %v2248_v36, 0.0 }
 0x4ec   :  { %2251 = vpow2.f32 %v1002_v37  ;;  %548 = vadd.xlane.f32.xlu1 %v547_v38 }
 0x4ee   :  { %v2696_v39 = vpop.eup %2249 }
 0x4ef   :  { %v894_v40 = vsel %vm428_vm3, %v2696_v39, 0.0  ;;  %v1115_v43 = vpop.xlane.xlu1 %1114 }
 0x4f0   :  { %895 = vadd.xlane.f32.xlu0 %v894_v40  ;;  %v1116_v44 = vsub.f32 %v1107_v3, %v1115_v43 }
 0x4f2   :  { %v1117_v45 = vmul.f32 1.442695, %v1116_v44 }
 0x4f4   :  { %2253 = vpow2.f32 %v1117_v45 }
 0x4f6   :  { %v2700_v41 = vpop.eup %2251 }
 0x4f7   :  { %v1004_v42 = vsel %vm428_vm3, %v2700_v41, 0.0  ;;  %v1230_v46 = vpop.xlane.xlu0 %1229 }
 0x4f8   :  { %1005 = vadd.xlane.f32.xlu0 %v1004_v42  ;;  %v1231_v47 = vsub.f32 %v1222_v8, %v1230_v46 }
 0x4fa   :  { %v1232_v49 = vmul.f32 1.442695, %v1231_v47 }
 0x4fc   :  { %2255 = vpow2.f32 %v1232_v49 }
 0x4fd   :  { %554 = vrot.lane.b32.xlu1 %v2628_v57, %s2433_s2 }
 0x4fe   :  { %v2710_v48 = vpop.eup %2253 }
 0x4ff   :  { %v1119_v50 = vsel %vm428_vm3, %v2710_v48, 0.0 }
 0x506   :  { %v2714_v51 = vpop.eup %2255 }
 0x507   :  { %v1234_v52 = vsel %vm428_vm3, %v2714_v51, 0.0 }
 0x50e   :  { %670 = vrot.lane.b32.xlu0 %v2628_v57, %s2427_s0 }
 0x512   :  { %786 = vrot.lane.b32.xlu0 %v2628_v57, %s2434_s22 }
 0x521   :  { %1120 = vadd.xlane.f32.xlu1 %v1119_v50 }
 0x531   :  { %1235 = vadd.xlane.f32.xlu0 %v1234_v52 }
 0x532   :  { %1010 = vrot.lane.b32.xlu1 %v900_v53, %s2433_s2 }
 0x536   :  { %1240 = vrot.lane.b32.xlu1 %v900_v53, %s2434_s22 }
 0x547   :  { %1125 = vrot.lane.b32.xlu0 %v900_v53, %s2427_s0  ;;  %v2191_v53 = vld [vmem:[#allocation8] sm:$0xff]  }
 0x548   :  { %2123 = vmatpush3.bf16.msra.mxu0 %v2191_v53  ;;  %v2220_v53 = vld [vmem:[#allocation9 + $0x70] ss:$8 sps:$4 sm:$0xff]  }
 0x549   :  { %2124 = vmatprep.subr.bf16.mxu0 %v2431_v1 }
 0x56d   :  { %v666_v56 = vpop.xlane.xlu0 %665 }
 0x575   :  { %v782_v54 = vpop.xlane.xlu1 %781 }
 0x579   :  { %v549_v55 = vpop.xlane.xlu1 %548 }
 0x57a   :  { %2257 = vrcp.f32 %v549_v55  ;;  %v2193_v55 = vld [vmem:[#allocation8 + $0x10] sm:$0xff]  }
 0x57b   :  { %2259 = vrcp.f32 %v666_v56  ;;  %v2194_v56 = vld [vmem:[#allocation8 + $0x18] sm:$0xff]  }
 0x57c   :  { %2261 = vrcp.f32 %v782_v54  ;;  %v2192_v54 = vld [vmem:[#allocation8 + $0x8] sm:$0xff]  }
 0x57d   :  { %v555_v58 = vpop.permute.xlu1 %554  ;;  %v896_v60 = vpop.xlane.xlu0 %895  ;;  %2125 = vmatpush3.bf16.msra.mxu0 %v2192_v54  ;;  %v2223_v54 = vld [vmem:[#allocation11 + $0x40] sm:$0xff]  }
 0x57e   :  { %v560_v59 = vsel %vm444_vm2, %v555_v58, 0  ;;  %2263 = vrcp.f32 %v896_v60  ;;  %2126 = vmatprep.subr.bf16.mxu0 %v2431_v1 }
 0x57f   :  { %2045 = vmatpush3.bf16.msra.mxu1 %v560_v59 }
 0x580   :  { %2056 = vmatprep.subr.bf16.mxu1 %v2431_v1 }
 0x581   :  { %2127 = vmatpush3.bf16.msra.mxu0 %v2193_v55  ;;  %v2224_v55 = vld [vmem:[#allocation11] sm:$0xff]  }
 0x582   :  { %2128 = vmatprep.subr.bf16.mxu0 %v2431_v1 }
 0x584   :  { %v2258_v57 = vpop.eup %2257 }
 0x585   :  { %v551_v61 = vmul.f32 %v2258_v57, %v2248_v36  ;;  %v1006_v62 = vpop.xlane.xlu0 %1005  ;;  %v2260_v2 = vpop.eup %2259  ;;  %2129 = vmatpush3.bf16.msra.mxu0 %v2194_v56  ;;  %v2225_v56 = vld [vmem:[#allocation11 + $0x48] sm:$0xff]  }
 0x586   :  { %v668_v5 = vmul.f32 %v2260_v2, %v2687_v22  ;;  %v2262_v8 = vpop.eup %2261  ;;  %2265 = vrcp.f32 %v1006_v62  ;;  %2130 = vmatprep.subr.bf16.mxu0 %v2431_v1  ;;  %v2196_v62 = vld [vmem:[#allocation8 + $0x28] sm:$0xff]   ;;  %v2198_v2 = vld [vmem:[#allocation8 + $0x38] sm:$0xff]  }
 0x587   :  { %v552_v63 = vpack.c.bf16 %v551_v61, %v551_v61  ;;  %v784_v10 = vmul.f32 %v2262_v8, %v2691_v29  ;;  %v2195_v61 = vld [vmem:[#allocation8 + $0x20] sm:$0xff]  }
 0x588   :  { %v669_v7 = vpack.c.bf16 %v668_v5, %v668_v5  ;;  %v2264_v12 = vpop.eup %2263 }
 0x589   :  { %v671_v3 = vpop.permute.xlu0 %670  ;;  %2047 = vmatmul.mubr.msk.bf16.vlgmr.msra.gmra.mrb[16].mxu1 %vm428_vm3, %v552_v63  ;;  %v785_v11 = vpack.c.bf16 %v784_v10, %v784_v10  ;;  %v898_v14 = vmul.f32 %v2264_v12, %v2696_v39  ;;  %2131 = vmatpush3.bf16.msra.mxu0 %v2195_v61  ;;  %v2197_v63 = vld [vmem:[#allocation8 + $0x30] sm:$0xff]   ;;  %v2230_v61 = vld [vmem:[#allocation11 + $0x18] sm:$0xff]  }
 0x58a   :  { %v676_v4 = vsel %vm444_vm2, %v671_v3, 0  ;;  %2058 = vmatprep.mubr.msk.bf16.mxu1 %vm2432_vm0, %v2431_v1  ;;  %2132 = vmatprep.subr.bf16.mxu0 %v2431_v1 }
 0x58b   :  { %2057 = vmatpush3.bf16.msra.mxu1 %v676_v4  ;;  %v899_v15 = vpack.c.bf16 %v898_v14, %v898_v14 }
 0x58c   :  { %2068 = vmatprep.subr.bf16.mxu1 %v2431_v1 }
 0x58d   :  { %v787_v6 = vpop.permute.xlu0 %786  ;;  %2133 = vmatpush3.bf16.msra.mxu0 %v2196_v62  ;;  %v2231_v62 = vld [vmem:[#allocation11 + $0x60] sm:$0xff]  }
 0x58e   :  { %v792_v9 = vsel %vm444_vm2, %v787_v6, 0  ;;  %2134 = vmatprep.subr.bf16.mxu0 %v2431_v1 }
 0x590   :  { %v2266_v16 = vpop.eup %2265 }
 0x591   :  { %2059 = vmatmul.mubr.msk.bf16.vlgmr.msra.gmra.mrb[20].mxu1 %vm428_vm3, %v669_v7  ;;  %v1008_v18 = vmul.f32 %v2266_v16, %v2700_v41  ;;  %2135 = vmatpush3.bf16.msra.mxu0 %v2197_v63  ;;  %v2232_v63 = vld [vmem:[#allocation11 + $0x20] sm:$0xff]  }
 0x592   :  { %2069 = vmatpush3.bf16.msra.mxu1 %v792_v9  ;;  %2070 = vmatprep.mubr.msk.bf16.mxu1 %vm2432_vm0, %v2431_v1 }
 0x593   :  { %2080 = vmatprep.subr.bf16.mxu1 %v2431_v1  ;;  %v1009_v21 = vpack.c.bf16 %v1008_v18, %v1008_v18  ;;  %2136 = vmatprep.subr.bf16.mxu0 %v2431_v1 }
 0x595   :  { %2137 = vmatpush3.bf16.msra.mxu0 %v2198_v2  ;;  %v2233_v2 = vld [vmem:[#allocation11 + $0x68] sm:$0xff]  }
 0x596   :  { %1984 = vmatprep.subr.bf16.mxu0 %v2223_v54 }
 0x599   :  { %2071 = vmatmul.mubr.msk.bf16.vlgmr.msra.gmra.mrb[24].mxu1 %vm428_vm3, %v785_v11 }
 0x59a   :  { %2081 = vmatpush3.bf16.msra.mxu1 %v905_v13  ;;  %2082 = vmatprep.mubr.msk.bf16.mxu1 %vm2432_vm0, %v2431_v1 }
 0x59b   :  { %2092 = vmatprep.subr.bf16.mxu1 %v2431_v1 }
 0x5a1   :  { %2083 = vmatmul.mubr.msk.bf16.vlgmr.msra.gmra.mrb[28].mxu1 %vm428_vm3, %v899_v15 }
 0x5a2   :  { %2094 = vmatprep.mubr.msk.bf16.mxu1 %vm2432_vm0, %v2431_v1 }
 0x5ae   :  { %v1121_v17 = vpop.xlane.xlu1 %1120 }
 0x5af   :  { %2267 = vrcp.f32 %v1121_v17 }
 0x5b2   :  { %v1011_v19 = vpop.permute.xlu1 %1010 }
 0x5b3   :  { %v1016_v20 = vsel %vm444_vm2, %v1011_v19, 0  ;;  %v1888_v19 = vld [vmem:[%s2831_s4] ss:$0 sm:$0xff] }
 0x5b4   :  { %2093 = vmatpush3.bf16.msra.mxu1 %v1016_v20 }
 0x5b5   :  { %2104 = vmatprep.subr.bf16.mxu1 %v2431_v1 }
 0x5b6   :  { %v1241_v29 = vpop.permute.xlu1 %1240 }
 0x5b7   :  { %2095 = vmatmul.mubr.msk.bf16.vlgmr.msra.gmra.mrb[32].mxu1 %vm428_vm3, %v1009_v21  ;;  %v1246_v34 = vsel %vm444_vm2, %v1241_v29, 0 }
 0x5b8   :  { %2106 = vmatprep.mubr.msk.bf16.mxu1 %vm2432_vm0, %v2431_v1 }
 0x5b9   :  { %v2268_v22 = vpop.eup %2267 }
 0x5ba   :  { %v1123_v26 = vmul.f32 %v2268_v22, %v2710_v48 }
 0x5bc   :  { %v1124_v32 = vpack.c.bf16 %v1123_v26, %v1123_v26 }
 0x5be   :  { %v1236_v25 = vpop.xlane.xlu0 %1235 }
 0x5bf   :  { %2269 = vrcp.f32 %v1236_v25 }
 0x5c2   :  { %v1126_v27 = vpop.permute.xlu0 %1125 }
 0x5c3   :  { %v1131_v28 = vsel %vm444_vm2, %v1126_v27, 0 }
 0x5c4   :  { %2105 = vmatpush3.bf16.msra.mxu1 %v1131_v28 }
 0x5c5   :  { %2116 = vmatprep.subr.bf16.mxu1 %v2431_v1 }
 0x5c7   :  { %2107 = vmatmul.mubr.msk.bf16.vlgmr.msra.gmra.mrb[36].mxu1 %vm428_vm3, %v1124_v32  ;;  %v2199_v32 = vld [vmem:[#allocation9] ss:$8 sps:$4 sm:$0xff]  }
 0x5c8   :  { %2117 = vmatpush3.bf16.msra.mxu1 %v1246_v34  ;;  %2118 = vmatprep.mubr.msk.bf16.mxu1 %vm2432_vm0, %v2431_v1  ;;  %v2201_v34 = vld [vmem:[#allocation9 + $0x4] ss:$8 sps:$4 sm:$0xff]  }
 0x5c9   :  { %v2270_v35 = vpop.eup %2269  ;;  %1560 = vmatprep.subr.bf16.mxu1 %v2201_v34 }
 0x5ca   :  { %v1238_v36 = vmul.f32 %v2270_v35, %v2714_v51  ;;  %v2204_v35 = vld [vmem:[#allocation9 + $0x14] ss:$8 sps:$4 sm:$0xff]  }
 0x5cc   :  { %v1239_v37 = vpack.c.bf16 %v1238_v36, %v1238_v36  ;;  %v2202_v36 = vld [vmem:[#allocation9 + $0x10] ss:$8 sps:$4 sm:$0xff]  }
 0x5cf   :  { %2119 = vmatmul.mubr.msk.bf16.vlgmr.msra.gmra.mrb[40].mxu1 %vm428_vm3, %v1239_v37 }
 0x5d0   :  { %1592 = vmatprep.mubr.bf16.mxu1 %v2430_v0  ;;  %1561 = vmatpush1.bf16.msra.mxu1 %v2199_v32 }
 0x5d1   :  { %1562 = vmatprep.subr.bf16.mxu1 %v2204_v35 }
 0x5d4   :  { %1563 = vmatpush1.bf16.msra.mxu1 %v2202_v36 }
 0x65c   :  { %v596_v38 = vpop.f32.mrb[16].mxu1 }
 0x65d   :  { %603 = vrot.lane.b32.xlu1 %v596_v38, %s2434_s22  ;;  %v2048_v39 = vpop.f32.mrb[17].mxu1 }
 0x65e   :  { %v599_v40 = vpop.f32.mrb[18].mxu1 }
 0x65f   :  { %v2049_v41 = vpop.f32.mrb[19].mxu1 }
 0x664   :  { %v712_v42 = vpop.f32.mrb[20].mxu1 }
 0x665   :  { %719 = vrot.lane.b32.xlu1 %v712_v42, %s2427_s0  ;;  %v2060_v43 = vpop.f32.mrb[21].mxu1 }
 0x666   :  { %v715_v44 = vpop.f32.mrb[22].mxu1  ;;  %v2207_v43 = vld [vmem:[#allocation9 + $0x24] ss:$8 sps:$4 sm:$0xff]  }
 0x667   :  { %v2061_v45 = vpop.f32.mrb[23].mxu1  ;;  %v2205_v44 = vld [vmem:[#allocation9 + $0x20] ss:$8 sps:$4 sm:$0xff]   ;;  %1564 = vmatprep.subr.bf16.mxu1 %v2207_v43 }
 0x668   :  { %1565 = vmatpush1.bf16.msra.mxu1 %v2205_v44  ;;  %v2210_v45 = vld [vmem:[#allocation9 + $0x34] ss:$8 sps:$4 sm:$0xff]  }
 0x669   :  { %1566 = vmatprep.subr.bf16.mxu1 %v2210_v45 }
 0x66c   :  { %v828_v46 = vpop.f32.mrb[24].mxu1 }
 0x66d   :  { %v2072_v47 = vpop.f32.mrb[25].mxu1 }
 0x66e   :  { %v831_v48 = vpop.f32.mrb[26].mxu1  ;;  %v2213_v47 = vld [vmem:[#allocation9 + $0x44] ss:$8 sps:$4 sm:$0xff]  }
 0x66f   :  { %v2073_v49 = vpop.f32.mrb[27].mxu1  ;;  %v2211_v48 = vld [vmem:[#allocation9 + $0x40] ss:$8 sps:$4 sm:$0xff]  }
 0x670   :  { %v2216_v49 = vld [vmem:[#allocation9 + $0x54] ss:$8 sps:$4 sm:$0xff]  }
 0x674   :  { %v941_v50 = vpop.f32.mrb[28].mxu1 }
 0x675   :  { %947 = vst.msk [vmem:[#allocation2 + $0x8] sm:$0xff] %vm381_vm1, %v941_v50  ;;  %v2084_v0 = vpop.f32.mrb[29].mxu1  ;;  %v2214_v50 = vld [vmem:[#allocation9 + $0x50] ss:$8 sps:$4 sm:$0xff]  }
 0x676   :  { %v944_v51 = vpop.f32.mrb[30].mxu1  ;;  %v2219_v0 = vld [vmem:[#allocation9 + $0x64] ss:$8 sps:$4 sm:$0xff]  }
 0x677   :  { %v2085_v52 = vpop.f32.mrb[31].mxu1  ;;  %v2217_v51 = vld [vmem:[#allocation9 + $0x60] ss:$8 sps:$4 sm:$0xff]  }
 0x678   :  { %v2222_v52 = vld [vmem:[#allocation9 + $0x74] ss:$8 sps:$4 sm:$0xff]  }
 0x68a   :  { %v1052_v58 = vpop.f32.mrb[32].mxu1 }
 0x68b   :  { %1059 = vrot.lane.b32.xlu1 %v1052_v58, %s2434_s22  ;;  %v2096_v59 = vpop.f32.mrb[33].mxu1  ;;  %v2226_v58 = vld [vmem:[#allocation11 + $0x8] sm:$0xff]  }
 0x68c   :  { %v1055_v60 = vpop.f32.mrb[34].mxu1  ;;  %v2227_v59 = vld [vmem:[#allocation11 + $0x50] sm:$0xff]  }
 0x68d   :  { %v2097_v57 = vpop.f32.mrb[35].mxu1  ;;  %v2228_v60 = vld [vmem:[#allocation11 + $0x10] sm:$0xff]  }
 0x68e   :  { %v2229_v57 = vld [vmem:[#allocation11 + $0x58] sm:$0xff]  }
 0x68f   :  { %835 = vrot.lane.b32.xlu1 %v828_v46, %s2433_s2  ;;  %v2208_v46 = vld [vmem:[#allocation9 + $0x30] ss:$8 sps:$4 sm:$0xff]  }
 0x690   :  { %1567 = vmatpush1.bf16.msra.mxu1 %v2208_v46 }
 0x691   :  { %1568 = vmatprep.subr.bf16.mxu1 %v2213_v47 }
 0x694   :  { %1569 = vmatpush1.bf16.msra.mxu1 %v2211_v48 }
 0x695   :  { %1570 = vmatprep.subr.bf16.mxu1 %v2216_v49 }
 0x698   :  { %1571 = vmatpush1.bf16.msra.mxu1 %v2214_v50 }
 0x699   :  { %1572 = vmatprep.subr.bf16.mxu1 %v2219_v0 }
 0x69a   :  { %v1167_v3 = vpop.f32.mrb[36].mxu1 }
 0x69b   :  { %1174 = vrot.lane.b32.xlu0 %v1167_v3, %s2427_s0  ;;  %v2108_v4 = vpop.f32.mrb[37].mxu1 }
 0x69c   :  { %v1170_v5 = vpop.f32.mrb[38].mxu1  ;;  %1573 = vmatpush1.bf16.msra.mxu1 %v2217_v51 }
 0x69d   :  { %v2109_v6 = vpop.f32.mrb[39].mxu1  ;;  %1574 = vmatprep.subr.bf16.mxu1 %v2222_v52 }
 0x6a0   :  { %1575 = vmatpush1.bf16.msra.mxu1 %v2220_v53 }
 0x6a2   :  { %v1282_v7 = vpop.f32.mrb[40].mxu1 }
 0x6a3   :  { %1289 = vrot.lane.b32.xlu0 %v1282_v7, %s2433_s2  ;;  %v2120_v8 = vpop.f32.mrb[41].mxu1 }
 0x6a4   :  { %v1285_v9 = vpop.f32.mrb[42].mxu1 }
 0x6a5   :  { %v2121_v10 = vpop.f32.mrb[43].mxu1 }
 0x6a6   :  { %v1897_v10 = vld [vmem:[%s2836_s9] ss:$0 sm:$0xff] }
 0x6cf   :  { %v604_v11 = vpop.permute.xlu1 %603 }
 0x6d0   :  { %607 = vst.msk [vmem:[#allocation2] sm:$0xff] %vm606_vm4, %v604_v11 }
 0x6d7   :  { %v720_v12 = vpop.permute.xlu1 %719 }
 0x6d8   :  { %723 = vst.msk [vmem:[#allocation2] sm:$0xff] %vm722_vm5, %v720_v12 }
 0x6fd   :  { %v1060_v1 = vpop.permute.xlu1 %1059 }
 0x6fe   :  { %1062 = vst.msk [vmem:[#allocation2 + $0x8] sm:$0xff] %vm606_vm4, %v1060_v1 }
 0x701   :  { %v836_v13 = vpop.permute.xlu1 %835 }
 0x702   :  { %839 = vst.msk [vmem:[#allocation2] sm:$0xff] %vm838_vm6, %v836_v13 }
 0x709   :  { %v1293_v16 = vld [vmem:[#allocation2] sm:$0xff] }
 0x70d   :  { %v1175_v14 = vpop.permute.xlu0 %1174 }
 0x70e   :  { %1177 = vst.msk [vmem:[#allocation2 + $0x8] sm:$0xff] %vm722_vm5, %v1175_v14  ;;  %v1898_v14 = vld [vmem:[%s2837_s10] ss:$0 sm:$0xff] }
 0x715   :  { %v1290_v15 = vpop.permute.xlu0 %1289 }
 0x716   :  { %1292 = vst.msk [vmem:[#allocation2 + $0x8] sm:$0xff] %vm838_vm6, %v1290_v15 }
 0x71d   :  { %v1294_v17 = vld [vmem:[#allocation2 + $0x8] sm:$0xff] }
 0x71e   :  { %v1295_v18 = vpack.c.bf16 %v1294_v17, %v1293_v16 }
 0x720   :  { %2139 = vmatmul.mubr.bf16.vlgmr.msra.gmra.mrb[28].mxu0 %v1295_v18 }
 0x721   :  { %1985 = vmatpush3.bf16.msra.mxu0 %v2224_v55 }
 0x722   :  { %1986 = vmatprep.subr.bf16.mxu0 %v2225_v56 }
 0x725   :  { %1987 = vmatpush3.bf16.msra.mxu0 %v2226_v58 }
 0x726   :  { %1988 = vmatprep.subr.bf16.mxu0 %v2227_v59 }
 0x729   :  { %1989 = vmatpush3.bf16.msra.mxu0 %v2228_v60 }
 0x72a   :  { %1990 = vmatprep.subr.bf16.mxu0 %v2229_v57 }
 0x72d   :  { %1991 = vmatpush3.bf16.msra.mxu0 %v2230_v61 }
 0x72e   :  { %1992 = vmatprep.subr.bf16.mxu0 %v2231_v62 }
 0x731   :  { %1993 = vmatpush3.bf16.msra.mxu0 %v2232_v63 }
 0x732   :  { %1994 = vmatprep.subr.bf16.mxu0 %v2233_v2 }
 0x7f3   :  { %v1401_v20 = vpop.f32.mrb[28].mxu0 }
 0x7f4   :  { %v1402_v21 = vadd.f32 %v1888_v19, %v1401_v20  ;;  %v2140_v22 = vpop.f32.mrb[29].mxu0  ;;  %v2235_v20 = vld [vmem:[#allocation11 + $0x70] sm:$0xff]  }
 0x7f5   :  { %v1404_v25 = vpop.f32.mrb[30].mxu0  ;;  %v2237_v22 = vld [vmem:[#allocation11 + $0x78] sm:$0xff]  }
 0x7f6   :  { %v1405_v26 = vadd.f32 %v1888_v19, %v1404_v25  ;;  %v2141_v27 = vpop.f32.mrb[31].mxu0  ;;  %v1408_v28 = vadd.f32 %v1402_v21, %v2581_v23  ;;  %v2234_v19 = vld [vmem:[#allocation11 + $0x28] sm:$0xff]   ;;  %v2236_v21 = vld [vmem:[#allocation11 + $0x30] sm:$0xff]   ;;  %v2238_v25 = vld [vmem:[#allocation11 + $0x38] sm:$0xff]  }
 0x7f7   :  { %1995 = vmatpush3.bf16.msra.mxu0 %v2234_v19 }
 0x7f8   :  { %1410 = vadd.xlane.f32.xlu1 %v1408_v28  ;;  %v1409_v29 = vadd.f32 %v1405_v26, %v2583_v24  ;;  %1996 = vmatprep.subr.bf16.mxu0 %v2235_v20  ;;  %v1468_v26 = vld [vmem:[%s2833_s6] sm:$0x3] }
 0x7f9   :  { %v1473_v27 = vrot.slane %v1468_v26, %v153_v31 }
 0x7fa   :  { %1412 = vadd.xlane.f32.xlu0 %v1409_v29 }
 0x7fb   :  { %1997 = vmatpush3.bf16.msra.mxu0 %v2236_v21 }
 0x7fc   :  { %1998 = vmatprep.subr.bf16.mxu0 %v2237_v22 }
 0x7ff   :  { %1999 = vmatpush3.bf16.msra.mxu0 %v2238_v25 }
 0x885   :  { %v1411_v37 = vpop.xlane.xlu1 %1410 }
 0x886   :  { %v1415_v38 = vmul.f32 0.0078125, %v1411_v37 }
 0x887   :  { %v1413_v39 = vpop.xlane.xlu0 %1412 }
 0x888   :  { %v2780_v40 = vsub.f32 %v1408_v28, %v1415_v38  ;;  %v1416_v41 = vmul.f32 0.0078125, %v1413_v39  ;;  %v1477_v28 = vrot.slane %v1468_v26, %v157_v33 }
 0x88a   :  { %v2782_v42 = vsub.f32 %v1409_v29, %v1416_v41  ;;  %v1419_v23 = vmul.f32 %v2780_v40, %v2780_v40 }
 0x88c   :  { %1421 = vadd.xlane.f32.xlu0 %v1419_v23  ;;  %v1420_v24 = vmul.f32 %v2782_v42, %v2782_v42 }
 0x88e   :  { %1423 = vadd.xlane.f32.xlu1 %v1420_v24 }
 0x919   :  { %v1422_v3 = vpop.xlane.xlu0 %1421 }
 0x91a   :  { %v1425_v4 = vmul.f32 0.0078125, %v1422_v3 }
 0x91b   :  { %v1424_v5 = vpop.xlane.xlu1 %1423 }
 0x91c   :  { %v1427_v6 = vadd.f32 1e-05, %v1425_v4  ;;  %v1426_v7 = vmul.f32 0.0078125, %v1424_v5  ;;  %v1932_v4 = vld [vmem:[%s2838_s11] ss:$0 sm:$0xff] }
 0x91e   :  { %2271 = vrsqrt.f32 %v1427_v6  ;;  %v1428_v8 = vadd.f32 1e-05, %v1426_v7  ;;  %v1933_v7 = vld [vmem:[%s2839_s12] ss:$0 sm:$0xff] }
 0x920   :  { %2273 = vrsqrt.f32 %v1428_v8 }
 0x928   :  { %v2272_v9 = vpop.eup %2271 }
 0x929   :  { %v1431_v11 = vmul.f32 %v2272_v9, %v2780_v40 }
 0x92a   :  { %v2274_v12 = vpop.eup %2273 }
 0x92b   :  { %v1432_v1 = vmul.f32 %v2274_v12, %v2782_v42  ;;  %v1440_v13 = vmul.f32 %v1897_v10, %v1431_v11 }
 0x92d   :  { %v1441_v15 = vmul.f32 %v1897_v10, %v1432_v1  ;;  %v1449_v16 = vadd.f32 %v1898_v14, %v1440_v13 }
 0x92f   :  { %v1450_v17 = vadd.f32 %v1898_v14, %v1441_v15 }
 0x931   :  { %v1451_v18 = vpack.c.bf16 %v1450_v17, %v1449_v16 }
 0x933   :  { %1593 = vmatmul.mubr.bf16.vlgmr.msra.gmra.mrb[44].mxu1 %v1451_v18 }
 0xa06   :  { %v1594_v29 = vpop.f32.mrb[44].mxu1 }
 0xa07   :  { %v1595_v32 = vadd.f32 %v1594_v29, %v1473_v27  ;;  %v1596_v34 = vpop.f32.mrb[45].mxu1 }
 0xa08   :  { %v1597_v35 = vadd.f32 %v1596_v34, %v1477_v28  ;;  %v1598_v36 = vpop.f32.mrb[46].mxu1 }
 0xa09   :  { %v1599_v37 = vadd.f32 %v1598_v36, %v1473_v27  ;;  %v1600_v38 = vpop.f32.mrb[47].mxu1  ;;  %v1603_v40 = vmax.f32 %v1595_v32, 0.0 }
 0xa0a   :  { %v1601_v39 = vadd.f32 %v1600_v38, %v1477_v28  ;;  %v1604_v42 = vmax.f32 %v1597_v35, 0.0 }
 0xa0b   :  { %v1605_v41 = vmax.f32 %v1599_v37, 0.0 }
 0xa0c   :  { %v1606_v23 = vmax.f32 %v1601_v39, 0.0 }
 0xa0d   :  { %v1607_v24 = vpack.c.bf16 %v1605_v41, %v1603_v40 }
 0xa0e   :  { %v1608_v43 = vpack.c.bf16 %v1606_v23, %v1604_v42 }
 0xa10   :  { %1776 = vmatprep.mubr.bf16.mxu0 %v1608_v43 }
 0xa11   :  { %1777 = vmatmul.mubr.bf16.vlgmr.msra.gmra.mrb[32].mxu0 %v1607_v24 }
 0xae4   :  { %v2000_v31 = vpop.f32.mrb[32].mxu0 }
 0xae5   :  { %v2001_v33 = vpop.f32.mrb[33].mxu0 }
 0xae6   :  { %v2002_v44 = vadd.f32 %v2001_v33, %v2000_v31  ;;  %v2003_v45 = vpop.f32.mrb[34].mxu0 }
 0xae7   :  { %v2004_v46 = vpop.f32.mrb[35].mxu0 }
 0xae8   :  { %v1779_v47 = vadd.f32 %v2002_v44, %v1915_v30  ;;  %v2005_v48 = vadd.f32 %v2004_v46, %v2003_v45 }
 0xaea   :  { %v1782_v49 = vadd.f32 %v2005_v48, %v1915_v30  ;;  %v1785_v50 = vadd.f32 %v1779_v47, %v1449_v16 }
 0xaec   :  { %1787 = vadd.xlane.f32.xlu0 %v1785_v50  ;;  %v1786_v0 = vadd.f32 %v1782_v49, %v1450_v17 }
 0xaee   :  { %1789 = vadd.xlane.f32.xlu1 %v1786_v0 }
 0xb79   :  { %v1788_v51 = vpop.xlane.xlu0 %1787 }
 0xb7a   :  { %v1791_v52 = vmul.f32 0.0078125, %v1788_v51 }
 0xb7b   :  { %v1790_v53 = vpop.xlane.xlu1 %1789 }
 0xb7c   :  { %v1793_v54 = vsub.f32 %v1785_v50, %v1791_v52  ;;  %v1792_v55 = vmul.f32 0.0078125, %v1790_v53 }
 0xb7e   :  { %v1794_v56 = vsub.f32 %v1786_v0, %v1792_v55  ;;  %v1795_v58 = vmul.f32 %v1793_v54, %v1793_v54 }
 0xb80   :  { %1797 = vadd.xlane.f32.xlu0 %v1795_v58  ;;  %v1796_v59 = vmul.f32 %v1794_v56, %v1794_v56 }
 0xb82   :  { %1799 = vadd.xlane.f32.xlu1 %v1796_v59 }
 0xc0d   :  { %v1798_v60 = vpop.xlane.xlu0 %1797 }
 0xc0e   :  { %v1801_v57 = vmul.f32 0.0078125, %v1798_v60 }
 0xc0f   :  { %v1800_v61 = vpop.xlane.xlu1 %1799 }
 0xc10   :  { %v1803_v62 = vadd.f32 1e-05, %v1801_v57  ;;  %v1802_v63 = vmul.f32 0.0078125, %v1800_v61 }
 0xc12   :  { %2275 = vrsqrt.f32 %v1803_v62  ;;  %v1804_v2 = vadd.f32 1e-05, %v1802_v63 }
 0xc14   :  { %2277 = vrsqrt.f32 %v1804_v2 }
 0xc1c   :  { %v2276_v3 = vpop.eup %2275 }
 0xc1d   :  { %v1807_v5 = vmul.f32 %v2276_v3, %v1793_v54 }
 0xc1e   :  { %v2278_v6 = vpop.eup %2277 }
 0xc1f   :  { %v1808_v8 = vmul.f32 %v2278_v6, %v1794_v56  ;;  %v1816_v9 = vmul.f32 %v1932_v4, %v1807_v5 }
 0xc21   :  { %v1817_v10 = vmul.f32 %v1932_v4, %v1808_v8  ;;  %v1825_v11 = vadd.f32 %v1933_v7, %v1816_v9 }
 0xc23   :  { %v1826_v12 = vadd.f32 %v1933_v7, %v1817_v10  ;;  %1827 = vst [vmem:[#allocation12] sm:$0xff] %v1825_v11 }
 0xc25   :  { %1828 = vst [vmem:[#allocation12 + $0x8] sm:$0xff] %v1826_v12 }
 0xc26   :  { %2400 = shalt.err (!%p2397_p2)
}
 0xc27   :  { %s2401_s12 = scalar_lea.hbm %s2840_s13, 256 }
 0xc28   :  { %p2402_p3 = scmp.ne.s32.totalorder %s2840_s13, %s2401_s12  ;;  %p2405_p4 = scmp.lt.u32.totalorder %s2401_s12, %s2840_s13 }
 0xc2a   :  { %p2407_p5 = pnand %p2405_p4, %p2402_p3 }
 0xc2c   :  { %2410 = shalt.err (!%p2407_p5)
}
 0xc2d   :  { %1840 = dma.vmem_to_hbm [thread:$0]  %s1835_s16, 256, %s2840_s13, [#allocation5], %s2424_s26, %s2424_s26, %s2425_s17  }
 0xc2e   :  { %2417 = dma.done.wait [#allocation5], 256  }
 0xc2f   :  { %2418 = vsyncadd [#allocation5], 4294967040 }
 0xc30   :  { %1844 = vsyncpa [#allocation4], 1 }
 0xc31   :  { %1845 = vsyncpa [#allocation7], 1 }
 0xc32   :  { %1846 = vsyncpa [#allocation10], 1 }
 0xc33   :  { %1847 = vsyncpa [#allocation5], 1 }

</bundles_post_ra>
